<compile_context>
chip_gen: v7x
topology: tpu7x:2x2x1
jax: 0.10.0
libtpu: 0.0.40
codegen_flags: <defaults>
</compile_context>

<pallas_src>
import functools

import jax
import jax.numpy as jnp
from jax.experimental import pallas as pl
from jax.experimental.pallas import tpu as pltpu

NEG_INF = -1e30  # finite "minus infinity" (avoids inf-inf NaN edge cases)


def _round_up(x, m):
    return ((x + m - 1) // m) * m


def _choose_vocab_tile(H, V, TB, max_vocab_tile, vmem_budget_bytes):
    """Largest lane-dense vocab tile whose VMEM footprint fits the budget.

    Footprint ~= resident logits block (TB*V_pad f32) + resident b_out
    (V_pad f32) + double-buffered bf16 w_out tile (2*H*TV*2B).  The default
    budget (~48 MiB) is chosen so the same tiling also fits v7x's 64 MiB VMEM;
    v5e/v6e (128 MiB) could push larger.  For extremely large B*V one would
    shrink TB instead (each extra batch block re-streams w_out from HBM).
    """
    tv = min(_round_up(max_vocab_tile, 128), _round_up(V, 128))
    while tv > 128:
        v_pad = _round_up(V, tv)
        footprint = TB * v_pad * 4 + v_pad * 4 + 2 * H * tv * 2
        if footprint <= vmem_budget_bytes:
            break
        tv = max(128, (tv // 2) // 128 * 128)
    return tv


# ---------------------------------------------------------------------------
# Kernel
# ---------------------------------------------------------------------------
def _decoder_kernel(
    n_layers,
    # inputs
    emb_ref, embp_ref, h0_ref, c0_ref, enc_ref,
    w_ic_e_ref, w_ic_p_ref, b_ic_ref,
    w_aic_x_ref, w_aic_c_ref, b_aic_ref,
    w_attn_ref, w_ih_ref, w_hh_ref, b_lstm_ref,
    w_out_ref, b_out_ref,
    # outputs
    logp_ref, h_out_ref, c_out_ref, attn_w_ref,
    # scratch
    x_s, m_s, l_s,
):
    H = h0_ref.shape[-1]
    TV = w_out_ref.shape[-1]
    j = pl.program_id(1)

    # ---- decoder core: runs once per batch block (first vocab tile) -------
    @pl.when(j == 0)
    def _core():
        emb = emb_ref[...]          # (TB, H)
        embp = embp_ref[...]        # (TB, H)
        h = h0_ref[...]             # (TB, H)
        c = c0_ref[...]             # (TB, H)
        enc = enc_ref[...]          # (TB, S, H)

        # inputs_combine = relu(Linear(cat(emb, emb_p))) as two K=H dots summed
        # (avoids the VMEM copy a jnp.concatenate would materialize).
        ec = (jnp.dot(emb, w_ic_e_ref[...], preferred_element_type=jnp.float32)
              + jnp.dot(embp, w_ic_p_ref[...], preferred_element_type=jnp.float32)
              + b_ic_ref[...])
        ec = jnp.maximum(ec, 0.0)

        # GlobalAttention (Luong "general").  S is small, so score/context are
        # cheaper as VPU multiply + reduce than as TB batched M=1 matmuls.
        q = jnp.dot(h, w_attn_ref[...], preferred_element_type=jnp.float32)  # (TB, H)
        scores = jnp.sum(q[:, None, :] * enc, axis=-1)                        # (TB, S)
        m = jnp.max(scores, axis=-1, keepdims=True)
        e = jnp.exp(scores - m)
        attn = e / jnp.sum(e, axis=-1, keepdims=True)   # exact softmax (returned output)
        ctx = jnp.sum(attn[:, :, None] * enc, axis=1)   # (TB, H)
        attn_w_ref[...] = attn

        # attn_input_combine (again two K=H dots, no concatenate)
        x = (jnp.dot(ec, w_aic_x_ref[...], preferred_element_type=jnp.float32)
             + jnp.dot(ctx, w_aic_c_ref[...], preferred_element_type=jnp.float32)
             + b_aic_ref[...])

        # n_layers x (relu + one LSTM step), SAME cell weights and the shared
        # (h, c) -- matches the reference, which reuses self.lstm each loop.
        w_ih = w_ih_ref[...]        # (H, 4H)
        w_hh = w_hh_ref[...]        # (H, 4H)
        b_l = b_lstm_ref[...]       # (1, 4H) = b_ih + b_hh
        for _ in range(n_layers):   # small static trip count
            xr = jnp.maximum(x, 0.0)
            gates = (jnp.dot(xr, w_ih, preferred_element_type=jnp.float32)
                     + jnp.dot(h, w_hh, preferred_element_type=jnp.float32)
                     + b_l)                                   # (TB, 4H)
            i_g = jax.nn.sigmoid(gates[:, 0 * H:1 * H])
            f_g = jax.nn.sigmoid(gates[:, 1 * H:2 * H])
            g_g = jnp.tanh(gates[:, 2 * H:3 * H])
            o_g = jax.nn.sigmoid(gates[:, 3 * H:4 * H])
            c = f_g * c + i_g * g_g
            h = o_g * jnp.tanh(c)
            x = h

        h_out_ref[...] = h
        c_out_ref[...] = c
        x_s[...] = x.astype(x_s.dtype)    # cast to bf16 once; reused by every tile
        m_s[...] = jnp.full(m_s.shape, NEG_INF, m_s.dtype)
        l_s[...] = jnp.zeros(l_s.shape, l_s.dtype)

    # ---- vocab tile: bf16-streamed out-projection + online LSE ------------
    col = pl.multiple_of(j * TV, TV)
    logit_t = (jnp.dot(x_s[...], w_out_ref[...], preferred_element_type=jnp.float32)
               + b_out_ref[:, pl.ds(col, TV)])               # (TB, TV) f32
    logp_ref[:, pl.ds(col, TV)] = logit_t                     # raw logits for now

    m_prev = m_s[...]
    m_new = jnp.maximum(m_prev, jnp.max(logit_t, axis=-1, keepdims=True))
    l_s[...] = (l_s[...] * jnp.exp(m_prev - m_new)
                + jnp.sum(jnp.exp(logit_t - m_new), axis=-1, keepdims=True))
    m_s[...] = m_new

    # ---- last vocab tile: normalize the whole resident logits block -------
    @pl.when(j == pl.num_programs(1) - 1)
    def _finalize():
        lse = m_s[...] + jnp.log(l_s[...])
        logp_ref[...] = logp_ref[...] - lse


# ---------------------------------------------------------------------------
# Wrapper
# ---------------------------------------------------------------------------
def attn_decoder_forward(params, input_, input_p, hidden, cell, encoder_hiddens,
                         *, n_layers, max_vocab_tile=4096,
                         vmem_budget_bytes=48 * 1024 * 1024):
    """Mirrors AttnDecoderRNN.forward.

    input_, input_p : (B, 1) int32 token indices
    hidden, cell    : (1, B, H) float32
    encoder_hiddens : (B, S, H) float32
    returns (log_probs (B, V), hidden (1, B, H), cell (1, B, H), attn_weights (B, S))
    """
    B = input_.shape[0]
    H = params["w_attn"].shape[0]
    S = encoder_hiddens.shape[1]
    V = params["w_out"].shape[1]

    # JAX glue: embedding gather; dropout = identity (eval mode).
    embedded = params["embedding"][input_[:, 0]]      # (B, H)
    embedded_p = params["embedding"][input_p[:, 0]]   # (B, H)
    h0 = hidden[0]                                    # (B, H)
    c0 = cell[0]                                      # (B, H)

    # Split the 2H-wide Linears so the kernel does two K=H dots (no concat).
    w_ic_e, w_ic_p = params["w_ic"][:H], params["w_ic"][H:]
    w_aic_x, w_aic_c = params["w_aic"][:H], params["w_aic"][H:]
    b_lstm = params["b_ih"] + params["b_hh"]          # (1, 4H)

    # Batch block: as large as possible so w_out is streamed from HBM as few
    # times as possible (n_b == 1 whenever B <= 128).  Tail blocks (B not a
    # multiple of TB) compute on padding rows whose results are discarded.
    TB = B if B <= 128 else 128
    n_b = pl.cdiv(B, TB)

    # Vocab tile: as large as the VMEM budget allows; bf16 w_out streaming.
    TV = _choose_vocab_tile(H, V, TB, max_vocab_tile, vmem_budget_bytes)
    V_pad = _round_up(V, TV)
    n_v = V_pad // TV

    w_out = params["w_out"]
    b_out = params["b_out"]
    if V_pad != V:
        w_out = jnp.pad(w_out, ((0, 0), (0, V_pad - V)))
        # -1e30 bias padding -> padded logits vanish from the log-sum-exp.
        b_out = jnp.pad(b_out, ((0, 0), (0, V_pad - V)), constant_values=NEG_INF)
    w_out_bf16 = w_out.astype(jnp.bfloat16)           # halves HBM weight traffic

    kernel = functools.partial(_decoder_kernel, n_layers)
    batch_row = lambda b, j: (b, 0)
    batch_3d = lambda b, j: (b, 0, 0)
    const2 = lambda b, j: (0, 0)

    in_specs = [
        pl.BlockSpec((TB, H), batch_row),                    # embedded
        pl.BlockSpec((TB, H), batch_row),                    # embedded_p
        pl.BlockSpec((TB, H), batch_row),                    # h0
        pl.BlockSpec((TB, H), batch_row),                    # c0
        pl.BlockSpec((TB, S, H), batch_3d),                  # encoder_hiddens
        pl.BlockSpec((H, H), const2),                        # w_ic_e   (resident)
        pl.BlockSpec((H, H), const2),                        # w_ic_p
        pl.BlockSpec((1, H), const2),                        # b_ic
        pl.BlockSpec((H, H), const2),                        # w_aic_x
        pl.BlockSpec((H, H), const2),                        # w_aic_c
        pl.BlockSpec((1, H), const2),                        # b_aic
        pl.BlockSpec((H, H), const2),                        # w_attn
        pl.BlockSpec((H, 4 * H), const2),                    # w_ih
        pl.BlockSpec((H, 4 * H), const2),                    # w_hh
        pl.BlockSpec((1, 4 * H), const2),                    # b_lstm
        pl.BlockSpec((H, TV), lambda b, j: (0, j)),          # w_out bf16 (streamed)
        pl.BlockSpec((1, V_pad), const2),                    # b_out (resident full)
    ]
    out_specs = (
        pl.BlockSpec((TB, V_pad), batch_row),   # normalized log-probs (padded V),
                                                # VMEM-resident across the vocab axis
        pl.BlockSpec((TB, H), batch_row),       # hidden out
        pl.BlockSpec((TB, H), batch_row),       # cell out
        pl.BlockSpec((TB, S), batch_row),       # attn weights
    )
    out_shape = (
        jax.ShapeDtypeStruct((B, V_pad), jnp.float32),
        jax.ShapeDtypeStruct((B, H), jnp.float32),
        jax.ShapeDtypeStruct((B, H), jnp.float32),
        jax.ShapeDtypeStruct((B, S), jnp.float32),
    )
    scratch_shapes = [
        pltpu.VMEM((TB, H), jnp.bfloat16),   # x (final LSTM output, bf16 for MXU)
        pltpu.VMEM((TB, 1), jnp.float32),    # running max
        pltpu.VMEM((TB, 1), jnp.float32),    # running sum-exp
    ]

    log_probs_pad, h_out, c_out, attn_w = pl.pallas_call(
        kernel,
        grid=(n_b, n_v),
        in_specs=in_specs,
        out_specs=out_specs,
        out_shape=out_shape,
        scratch_shapes=scratch_shapes,
        compiler_params=pltpu.CompilerParams(
            dimension_semantics=("parallel", "arbitrary"),
            vmem_limit_bytes=64 * 1024 * 1024,
        ),
    )(
        embedded, embedded_p, h0, c0, encoder_hiddens,
        w_ic_e, w_ic_p, params["b_ic"],
        w_aic_x, w_aic_c, params["b_aic"],
        params["w_attn"], params["w_ih"], params["w_hh"], b_lstm,
        w_out_bf16, b_out,
    )

    return log_probs_pad[:, :V], h_out[None], c_out[None], attn_w


# ---------------------------------------------------------------------------
# Pure-JAX reference (same semantics / same attention assumption, full f32)
# ---------------------------------------------------------------------------
def _reference_forward(params, input_, input_p, hidden, cell, encoder_hiddens,
                       *, n_layers):
    H = params["w_attn"].shape[0]
    emb = params["embedding"][input_[:, 0]]
    embp = params["embedding"][input_p[:, 0]]
    h, c = hidden[0], cell[0]
    ec = jnp.maximum(
        jnp.concatenate([emb, embp], axis=1) @ params["w_ic"] + params["b_ic"], 0.0)
    q = h @ params["w_attn"]
    scores = jnp.einsum('bh,bsh->bs', q, encoder_hiddens)
    attn_w = jax.nn.softmax(scores, axis=-1)
    ctx = jnp.einsum('bs,bsh->bh', attn_w, encoder_hiddens)
    x = jnp.concatenate([ec, ctx], axis=1) @ params["w_aic"] + params["b_aic"]
    for _ in range(n_layers):
        xr = jnp.maximum(x, 0.0)
        gates = xr @ params["w_ih"] + params["b_ih"] + h @ params["w_hh"] + params["b_hh"]
        i_g = jax.nn.sigmoid(gates[:, :H])
        f_g = jax.nn.sigmoid(gates[:, H:2 * H])
        g_g = jnp.tanh(gates[:, 2 * H:3 * H])
        o_g = jax.nn.sigmoid(gates[:, 3 * H:4 * H])
        c = f_g * c + i_g * g_g
        h = o_g * jnp.tanh(c)
        x = h
    logits = x @ params["w_out"] + params["b_out"]
    return jax.nn.log_softmax(logits, axis=-1), h[None], c[None], attn_w


# ---------------------------------------------------------------------------
# Deterministic parameter init
# ---------------------------------------------------------------------------
def init_params(key, hidden_size, output_size):
    H, V = hidden_size, output_size
    ks = jax.random.split(key, 12)
    s = 0.1
    return {
        "embedding": s * jax.random.normal(ks[0], (V, H), jnp.float32),
        "w_ic":     s * jax.random.normal(ks[1], (2 * H, H), jnp.float32),
        "b_ic":     s * jax.random.normal(ks[2], (1, H), jnp.float32),
        "w_aic":    s * jax.random.normal(ks[3], (2 * H, H), jnp.float32),
        "b_aic":    s * jax.random.normal(ks[4], (1, H), jnp.float32),
        "w_attn":   s * jax.random.normal(ks[5], (H, H), jnp.float32),
        "w_ih":     s * jax.random.normal(ks[6], (H, 4 * H), jnp.float32),
        "w_hh":     s * jax.random.normal(ks[7], (H, 4 * H), jnp.float32),
        "b_ih":     s * jax.random.normal(ks[8], (1, 4 * H), jnp.float32),
        "b_hh":     s * jax.random.normal(ks[9], (1, 4 * H), jnp.float32),
        "w_out":    s * jax.random.normal(ks[10], (H, V), jnp.float32),
        "b_out":    s * jax.random.normal(ks[11], (1, V), jnp.float32),
    }


if __name__ == "__main__":
    B, S, H, V = 4, 16, 128, 200   # V=200 exercises the padded-vocab path
    N_LAYERS = 2

    key = jax.random.PRNGKey(0)
    k_param, k_i, k_ip, k_h, k_c, k_enc = jax.random.split(key, 6)

    params = init_params(k_param, H, V)
    input_ = jax.random.randint(k_i, (B, 1), 0, V, dtype=jnp.int32)
    input_p = jax.random.randint(k_ip, (B, 1), 0, V, dtype=jnp.int32)
    hidden = 0.1 * jax.random.normal(k_h, (1, B, H), jnp.float32)
    cell = 0.1 * jax.random.normal(k_c, (1, B, H), jnp.float32)
    encoder_hiddens = 0.1 * jax.random.normal(k_enc, (B, S, H), jnp.float32)

    ref_lp, ref_h, ref_c, ref_a = _reference_forward(
        params, input_, input_p, hidden, cell, encoder_hiddens, n_layers=N_LAYERS)

    # Two configs: default large tile (single vocab tile at this size) and a
    # forced small tile to exercise the multi-tile online-LSE / in-kernel
    # normalization path.
    for tag, tile in (("auto-tile", 4096), ("multi-tile", 128)):
        log_probs, h_out, c_out, attn_w = attn_decoder_forward(
            params, input_, input_p, hidden, cell, encoder_hiddens,
            n_layers=N_LAYERS, max_vocab_tile=tile)
        jax.block_until_ready((log_probs, h_out, c_out, attn_w))

        assert log_probs.shape == (B, V)
        assert h_out.shape == (1, B, H)
        assert c_out.shape == (1, B, H)
        assert attn_w.shape == (B, S)

        checks = [
            ("log_probs", log_probs, ref_lp, 2e-2),   # bf16 w_out streaming
            ("hidden", h_out, ref_h, 1e-3),
            ("cell", c_out, ref_c, 1e-3),
            ("attn_weights", attn_w, ref_a, 1e-3),
        ]
        for name, got, want, tol in checks:
            err = float(jnp.max(jnp.abs(got - want)))
            assert err < tol, f"[{tag}] {name}: max abs err {err}"

    print("KERNEL_OK")
</pallas_src>

<mosaic_0001>
module attributes {stable_mosaic.version = 11 : i64} {
  func.func @_decoder_kernel(%arg0: i32, %arg1: i32, %arg2: memref<4x128xf32, #tpu.memory_space<vmem>>, %arg3: memref<4x128xf32, #tpu.memory_space<vmem>>, %arg4: memref<4x128xf32, #tpu.memory_space<vmem>>, %arg5: memref<4x128xf32, #tpu.memory_space<vmem>>, %arg6: memref<4x16x128xf32, #tpu.memory_space<vmem>>, %arg7: memref<128x128xf32, #tpu.memory_space<vmem>>, %arg8: memref<128x128xf32, #tpu.memory_space<vmem>>, %arg9: memref<1x128xf32, #tpu.memory_space<vmem>>, %arg10: memref<128x128xf32, #tpu.memory_space<vmem>>, %arg11: memref<128x128xf32, #tpu.memory_space<vmem>>, %arg12: memref<1x128xf32, #tpu.memory_space<vmem>>, %arg13: memref<128x128xf32, #tpu.memory_space<vmem>>, %arg14: memref<128x512xf32, #tpu.memory_space<vmem>>, %arg15: memref<128x512xf32, #tpu.memory_space<vmem>>, %arg16: memref<1x512xf32, #tpu.memory_space<vmem>>, %arg17: memref<128x256xbf16, #tpu.memory_space<vmem>>, %arg18: memref<1x256xf32, #tpu.memory_space<vmem>>, %arg19: memref<4x256xf32, #tpu.memory_space<vmem>>, %arg20: memref<4x128xf32, #tpu.memory_space<vmem>>, %arg21: memref<4x128xf32, #tpu.memory_space<vmem>>, %arg22: memref<4x16xf32, #tpu.memory_space<vmem>>, %arg23: memref<4x128xbf16, #tpu.memory_space<vmem>>, %arg24: memref<4x1xf32, #tpu.memory_space<vmem>>, %arg25: memref<4x1xf32, #tpu.memory_space<vmem>>) attributes {dimension_semantics = [#tpu.dimension_semantics<parallel>, #tpu.dimension_semantics<arbitrary>], iteration_bounds = array<i64: 1, 1>, scalar_prefetch = 0 : i64, scratch_operands = 3 : i64, tpu.core_type = #tpu.core_type<tc>, window_params = [{transform_indices = @transform_0, window_bounds = array<i64: 4, 128>}, {transform_indices = @transform_1, window_bounds = array<i64: 4, 128>}, {transform_indices = @transform_2, window_bounds = array<i64: 4, 128>}, {transform_indices = @transform_3, window_bounds = array<i64: 4, 128>}, {transform_indices = @transform_4, window_bounds = array<i64: 4, 16, 128>}, {pipeline_mode = #tpu.pipeline_mode<synchronous>, transform_indices = @transform_5, window_bounds = array<i64: 128, 128>}, {pipeline_mode = #tpu.pipeline_mode<synchronous>, transform_indices = @transform_6, window_bounds = array<i64: 128, 128>}, {pipeline_mode = #tpu.pipeline_mode<synchronous>, transform_indices = @transform_7, window_bounds = array<i64: 1, 128>}, {pipeline_mode = #tpu.pipeline_mode<synchronous>, transform_indices = @transform_8, window_bounds = array<i64: 128, 128>}, {pipeline_mode = #tpu.pipeline_mode<synchronous>, transform_indices = @transform_9, window_bounds = array<i64: 128, 128>}, {pipeline_mode = #tpu.pipeline_mode<synchronous>, transform_indices = @transform_10, window_bounds = array<i64: 1, 128>}, {pipeline_mode = #tpu.pipeline_mode<synchronous>, transform_indices = @transform_11, window_bounds = array<i64: 128, 128>}, {pipeline_mode = #tpu.pipeline_mode<synchronous>, transform_indices = @transform_12, window_bounds = array<i64: 128, 512>}, {pipeline_mode = #tpu.pipeline_mode<synchronous>, transform_indices = @transform_13, window_bounds = array<i64: 128, 512>}, {pipeline_mode = #tpu.pipeline_mode<synchronous>, transform_indices = @transform_14, window_bounds = array<i64: 1, 512>}, {transform_indices = @transform_15, window_bounds = array<i64: 128, 256>}, {pipeline_mode = #tpu.pipeline_mode<synchronous>, transform_indices = @transform_16, window_bounds = array<i64: 1, 256>}, {transform_indices = @transform_17, window_bounds = array<i64: 4, 256>}, {transform_indices = @transform_18, window_bounds = array<i64: 4, 128>}, {transform_indices = @transform_19, window_bounds = array<i64: 4, 128>}, {transform_indices = @transform_20, window_bounds = array<i64: 4, 16>}]} {
    %c0_i32 = arith.constant 0 : i32
    %0 = arith.cmpi eq, %arg1, %c0_i32 : i32
    %1 = arith.extui %0 : i1 to i32
    %c0_i32_0 = arith.constant 0 : i32
    %2 = arith.cmpi ne, %1, %c0_i32_0 : i32
    scf.if %2 {
      %c0_18 = arith.constant 0 : index
      %c0_19 = arith.constant 0 : index
      %33 = vector.load %arg2[%c0_18, %c0_19] : memref<4x128xf32, #tpu.memory_space<vmem>>, vector<4x128xf32>
      %c0_20 = arith.constant 0 : index
      %c0_21 = arith.constant 0 : index
      %34 = vector.load %arg3[%c0_20, %c0_21] : memref<4x128xf32, #tpu.memory_space<vmem>>, vector<4x128xf32>
      %c0_22 = arith.constant 0 : index
      %c0_23 = arith.constant 0 : index
      %35 = vector.load %arg4[%c0_22, %c0_23] : memref<4x128xf32, #tpu.memory_space<vmem>>, vector<4x128xf32>
      %c0_24 = arith.constant 0 : index
      %c0_25 = arith.constant 0 : index
      %36 = vector.load %arg5[%c0_24, %c0_25] : memref<4x128xf32, #tpu.memory_space<vmem>>, vector<4x128xf32>
      %c0_26 = arith.constant 0 : index
      %c0_27 = arith.constant 0 : index
      %c0_28 = arith.constant 0 : index
      %37 = vector.load %arg6[%c0_26, %c0_27, %c0_28] : memref<4x16x128xf32, #tpu.memory_space<vmem>>, vector<4x16x128xf32>
      %c0_29 = arith.constant 0 : index
      %c0_30 = arith.constant 0 : index
      %38 = vector.load %arg7[%c0_29, %c0_30] : memref<128x128xf32, #tpu.memory_space<vmem>>, vector<128x128xf32>
      %cst_31 = arith.constant dense<0.000000e+00> : vector<4x128xf32>
      %39 = tpu.matmul %33, %38, %cst_31 {dimension_numbers = #tpu.dot_dimension_numbers<[1], [0], [0], [1], [0, 0, 1, 1], [], []>} : vector<4x128xf32>, vector<128x128xf32>, vector<4x128xf32> -> vector<4x128xf32>
      %c0_32 = arith.constant 0 : index
      %c0_33 = arith.constant 0 : index
      %40 = vector.load %arg8[%c0_32, %c0_33] : memref<128x128xf32, #tpu.memory_space<vmem>>, vector<128x128xf32>
      %cst_34 = arith.constant dense<0.000000e+00> : vector<4x128xf32>
      %41 = tpu.matmul %34, %40, %cst_34 {dimension_numbers = #tpu.dot_dimension_numbers<[1], [0], [0], [1], [0, 0, 1, 1], [], []>} : vector<4x128xf32>, vector<128x128xf32>, vector<4x128xf32> -> vector<4x128xf32>
      %42 = arith.addf %39, %41 : vector<4x128xf32>
      %c0_35 = arith.constant 0 : index
      %c0_36 = arith.constant 0 : index
      %43 = vector.load %arg9[%c0_35, %c0_36] : memref<1x128xf32, #tpu.memory_space<vmem>>, vector<1x128xf32>
      %44 = vector.broadcast %43 : vector<1x128xf32> to vector<4x128xf32>
      %45 = arith.addf %42, %44 : vector<4x128xf32>
      %cst_37 = arith.constant 0.000000e+00 : f32
      %46 = vector.broadcast %cst_37 : f32 to vector<4x128xf32>
      %47 = arith.maximumf %45, %46 : vector<4x128xf32>
      %c0_38 = arith.constant 0 : index
      %c0_39 = arith.constant 0 : index
      %48 = vector.load %arg13[%c0_38, %c0_39] : memref<128x128xf32, #tpu.memory_space<vmem>>, vector<128x128xf32>
      %cst_40 = arith.constant dense<0.000000e+00> : vector<4x128xf32>
      %49 = tpu.matmul %35, %48, %cst_40 {dimension_numbers = #tpu.dot_dimension_numbers<[1], [0], [0], [1], [0, 0, 1, 1], [], []>} : vector<4x128xf32>, vector<128x128xf32>, vector<4x128xf32> -> vector<4x128xf32>
      %50 = vector.shape_cast %49 : vector<4x128xf32> to vector<4x1x128xf32>
      %51 = vector.broadcast %50 : vector<4x1x128xf32> to vector<4x16x128xf32>
      %52 = arith.mulf %51, %37 : vector<4x16x128xf32>
      %cst_41 = arith.constant dense<0.000000e+00> : vector<4x16xf32>
      %53 = vector.multi_reduction <add>, %52, %cst_41 [2] : vector<4x16x128xf32> to vector<4x16xf32>
      %cst_42 = arith.constant dense<0xFF800000> : vector<4xf32>
      %54 = vector.multi_reduction <maximumf>, %53, %cst_42 [1] : vector<4x16xf32> to vector<4xf32>
      %55 = vector.shape_cast %54 : vector<4xf32> to vector<4x1xf32>
      %56 = vector.broadcast %55 : vector<4x1xf32> to vector<4x16xf32>
      %57 = arith.subf %53, %56 : vector<4x16xf32>
      %58 = math.exp %57 : vector<4x16xf32>
      %cst_43 = arith.constant dense<0.000000e+00> : vector<4xf32>
      %59 = vector.multi_reduction <add>, %58, %cst_43 [1] : vector<4x16xf32> to vector<4xf32>
      %60 = vector.shape_cast %59 : vector<4xf32> to vector<4x1xf32>
      %61 = vector.broadcast %60 : vector<4x1xf32> to vector<4x16xf32>
      %62 = arith.divf %58, %61 : vector<4x16xf32>
      %63 = vector.shape_cast %62 : vector<4x16xf32> to vector<4x16x1xf32>
      %64 = vector.broadcast %63 : vector<4x16x1xf32> to vector<4x16x128xf32>
      %65 = arith.mulf %64, %37 : vector<4x16x128xf32>
      %cst_44 = arith.constant dense<0.000000e+00> : vector<4x128xf32>
      %66 = vector.multi_reduction <add>, %65, %cst_44 [1] : vector<4x16x128xf32> to vector<4x128xf32>
      %c0_45 = arith.constant 0 : index
      %c0_46 = arith.constant 0 : index
      %67 = vector.load %arg22[%c0_45, %c0_46] : memref<4x16xf32, #tpu.memory_space<vmem>>, vector<4x16xf32>
      tpu.vector_store %arg22[%c0_45, %c0_46], %62 {strides = array<i32>} : memref<4x16xf32, #tpu.memory_space<vmem>>, vector<4x16xf32>,
      %c0_47 = arith.constant 0 : index
      %c0_48 = arith.constant 0 : index
      %68 = vector.load %arg10[%c0_47, %c0_48] : memref<128x128xf32, #tpu.memory_space<vmem>>, vector<128x128xf32>
      %cst_49 = arith.constant dense<0.000000e+00> : vector<4x128xf32>
      %69 = tpu.matmul %47, %68, %cst_49 {dimension_numbers = #tpu.dot_dimension_numbers<[1], [0], [0], [1], [0, 0, 1, 1], [], []>} : vector<4x128xf32>, vector<128x128xf32>, vector<4x128xf32> -> vector<4x128xf32>
      %c0_50 = arith.constant 0 : index
      %c0_51 = arith.constant 0 : index
      %70 = vector.load %arg11[%c0_50, %c0_51] : memref<128x128xf32, #tpu.memory_space<vmem>>, vector<128x128xf32>
      %cst_52 = arith.constant dense<0.000000e+00> : vector<4x128xf32>
      %71 = tpu.matmul %66, %70, %cst_52 {dimension_numbers = #tpu.dot_dimension_numbers<[1], [0], [0], [1], [0, 0, 1, 1], [], []>} : vector<4x128xf32>, vector<128x128xf32>, vector<4x128xf32> -> vector<4x128xf32>
      %72 = arith.addf %69, %71 : vector<4x128xf32>
      %c0_53 = arith.constant 0 : index
      %c0_54 = arith.constant 0 : index
      %73 = vector.load %arg12[%c0_53, %c0_54] : memref<1x128xf32, #tpu.memory_space<vmem>>, vector<1x128xf32>
      %74 = vector.broadcast %73 : vector<1x128xf32> to vector<4x128xf32>
      %75 = arith.addf %72, %74 : vector<4x128xf32>
      %c0_55 = arith.constant 0 : index
      %c0_56 = arith.constant 0 : index
      %76 = vector.load %arg14[%c0_55, %c0_56] : memref<128x512xf32, #tpu.memory_space<vmem>>, vector<128x512xf32>
      %c0_57 = arith.constant 0 : index
      %c0_58 = arith.constant 0 : index
      %77 = vector.load %arg15[%c0_57, %c0_58] : memref<128x512xf32, #tpu.memory_space<vmem>>, vector<128x512xf32>
      %c0_59 = arith.constant 0 : index
      %c0_60 = arith.constant 0 : index
      %78 = vector.load %arg16[%c0_59, %c0_60] : memref<1x512xf32, #tpu.memory_space<vmem>>, vector<1x512xf32>
      %cst_61 = arith.constant 0.000000e+00 : f32
      %79 = vector.broadcast %cst_61 : f32 to vector<4x128xf32>
      %80 = arith.maximumf %75, %79 : vector<4x128xf32>
      %cst_62 = arith.constant dense<0.000000e+00> : vector<4x512xf32>
      %81 = tpu.matmul %80, %76, %cst_62 {dimension_numbers = #tpu.dot_dimension_numbers<[1], [0], [0], [1], [0, 0, 1, 1], [], []>} : vector<4x128xf32>, vector<128x512xf32>, vector<4x512xf32> -> vector<4x512xf32>
      %cst_63 = arith.constant dense<0.000000e+00> : vector<4x512xf32>
      %82 = tpu.matmul %35, %77, %cst_63 {dimension_numbers = #tpu.dot_dimension_numbers<[1], [0], [0], [1], [0, 0, 1, 1], [], []>} : vector<4x128xf32>, vector<128x512xf32>, vector<4x512xf32> -> vector<4x512xf32>
      %83 = arith.addf %81, %82 : vector<4x512xf32>
      %84 = vector.broadcast %78 : vector<1x512xf32> to vector<4x512xf32>
      %85 = arith.addf %83, %84 : vector<4x512xf32>
      %86 = vector.extract_strided_slice %85 {offsets = [0, 0], sizes = [4, 128], strides = [1, 1]} : vector<4x512xf32> to vector<4x128xf32>
      %87 = arith.negf %86 : vector<4x128xf32>
      %88 = math.exp %87 : vector<4x128xf32>
      %cst_64 = arith.constant 1.000000e+00 : f32
      %89 = vector.broadcast %cst_64 : f32 to vector<4x128xf32>
      %90 = arith.addf %89, %88 : vector<4x128xf32>
      %91 = arith.divf %89, %90 : vector<4x128xf32>
      %92 = vector.extract_strided_slice %85 {offsets = [0, 128], sizes = [4, 128], strides = [1, 1]} : vector<4x512xf32> to vector<4x128xf32>
      %93 = arith.negf %92 : vector<4x128xf32>
      %94 = math.exp %93 : vector<4x128xf32>
      %cst_65 = arith.constant 1.000000e+00 : f32
      %95 = vector.broadcast %cst_65 : f32 to vector<4x128xf32>
      %96 = arith.addf %95, %94 : vector<4x128xf32>
      %97 = arith.divf %95, %96 : vector<4x128xf32>
      %98 = vector.extract_strided_slice %85 {offsets = [0, 256], sizes = [4, 128], strides = [1, 1]} : vector<4x512xf32> to vector<4x128xf32>
      %99 = math.tanh %98 : vector<4x128xf32>
      %100 = vector.extract_strided_slice %85 {offsets = [0, 384], sizes = [4, 128], strides = [1, 1]} : vector<4x512xf32> to vector<4x128xf32>
      %101 = arith.negf %100 : vector<4x128xf32>
      %102 = math.exp %101 : vector<4x128xf32>
      %cst_66 = arith.constant 1.000000e+00 : f32
      %103 = vector.broadcast %cst_66 : f32 to vector<4x128xf32>
      %104 = arith.addf %103, %102 : vector<4x128xf32>
      %105 = arith.divf %103, %104 : vector<4x128xf32>
      %106 = arith.mulf %97, %36 : vector<4x128xf32>
      %107 = arith.mulf %91, %99 : vector<4x128xf32>
      %108 = arith.addf %106, %107 : vector<4x128xf32>
      %109 = math.tanh %108 : vector<4x128xf32>
      %110 = arith.mulf %105, %109 : vector<4x128xf32>
      %cst_67 = arith.constant 0.000000e+00 : f32
      %111 = vector.broadcast %cst_67 : f32 to vector<4x128xf32>
      %112 = arith.maximumf %110, %111 : vector<4x128xf32>
      %cst_68 = arith.constant dense<0.000000e+00> : vector<4x512xf32>
      %113 = tpu.matmul %112, %76, %cst_68 {dimension_numbers = #tpu.dot_dimension_numbers<[1], [0], [0], [1], [0, 0, 1, 1], [], []>} : vector<4x128xf32>, vector<128x512xf32>, vector<4x512xf32> -> vector<4x512xf32>
      %cst_69 = arith.constant dense<0.000000e+00> : vector<4x512xf32>
      %114 = tpu.matmul %110, %77, %cst_69 {dimension_numbers = #tpu.dot_dimension_numbers<[1], [0], [0], [1], [0, 0, 1, 1], [], []>} : vector<4x128xf32>, vector<128x512xf32>, vector<4x512xf32> -> vector<4x512xf32>
      %115 = arith.addf %113, %114 : vector<4x512xf32>
      %116 = vector.broadcast %78 : vector<1x512xf32> to vector<4x512xf32>
      %117 = arith.addf %115, %116 : vector<4x512xf32>
      %118 = vector.extract_strided_slice %117 {offsets = [0, 0], sizes = [4, 128], strides = [1, 1]} : vector<4x512xf32> to vector<4x128xf32>
      %119 = arith.negf %118 : vector<4x128xf32>
      %120 = math.exp %119 : vector<4x128xf32>
      %cst_70 = arith.constant 1.000000e+00 : f32
      %121 = vector.broadcast %cst_70 : f32 to vector<4x128xf32>
      %122 = arith.addf %121, %120 : vector<4x128xf32>
      %123 = arith.divf %121, %122 : vector<4x128xf32>
      %124 = vector.extract_strided_slice %117 {offsets = [0, 128], sizes = [4, 128], strides = [1, 1]} : vector<4x512xf32> to vector<4x128xf32>
      %125 = arith.negf %124 : vector<4x128xf32>
      %126 = math.exp %125 : vector<4x128xf32>
      %cst_71 = arith.constant 1.000000e+00 : f32
      %127 = vector.broadcast %cst_71 : f32 to vector<4x128xf32>
      %128 = arith.addf %127, %126 : vector<4x128xf32>
      %129 = arith.divf %127, %128 : vector<4x128xf32>
      %130 = vector.extract_strided_slice %117 {offsets = [0, 256], sizes = [4, 128], strides = [1, 1]} : vector<4x512xf32> to vector<4x128xf32>
      %131 = math.tanh %130 : vector<4x128xf32>
      %132 = vector.extract_strided_slice %117 {offsets = [0, 384], sizes = [4, 128], strides = [1, 1]} : vector<4x512xf32> to vector<4x128xf32>
      %133 = arith.negf %132 : vector<4x128xf32>
      %134 = math.exp %133 : vector<4x128xf32>
      %cst_72 = arith.constant 1.000000e+00 : f32
      %135 = vector.broadcast %cst_72 : f32 to vector<4x128xf32>
      %136 = arith.addf %135, %134 : vector<4x128xf32>
      %137 = arith.divf %135, %136 : vector<4x128xf32>
      %138 = arith.mulf %129, %108 : vector<4x128xf32>
      %139 = arith.mulf %123, %131 : vector<4x128xf32>
      %140 = arith.addf %138, %139 : vector<4x128xf32>
      %141 = math.tanh %140 : vector<4x128xf32>
      %142 = arith.mulf %137, %141 : vector<4x128xf32>
      %c0_73 = arith.constant 0 : index
      %c0_74 = arith.constant 0 : index
      %143 = vector.load %arg20[%c0_73, %c0_74] : memref<4x128xf32, #tpu.memory_space<vmem>>, vector<4x128xf32>
      tpu.vector_store %arg20[%c0_73, %c0_74], %142 {strides = array<i32>} : memref<4x128xf32, #tpu.memory_space<vmem>>, vector<4x128xf32>,
      %c0_75 = arith.constant 0 : index
      %c0_76 = arith.constant 0 : index
      %144 = vector.load %arg21[%c0_75, %c0_76] : memref<4x128xf32, #tpu.memory_space<vmem>>, vector<4x128xf32>
      tpu.vector_store %arg21[%c0_75, %c0_76], %140 {strides = array<i32>} : memref<4x128xf32, #tpu.memory_space<vmem>>, vector<4x128xf32>,
      %145 = arith.truncf %142 : vector<4x128xf32> to vector<4x128xbf16>
      %c0_77 = arith.constant 0 : index
      %c0_78 = arith.constant 0 : index
      %146 = vector.load %arg23[%c0_77, %c0_78] : memref<4x128xbf16, #tpu.memory_space<vmem>>, vector<4x128xbf16>
      tpu.vector_store %arg23[%c0_77, %c0_78], %145 {strides = array<i32>} : memref<4x128xbf16, #tpu.memory_space<vmem>>, vector<4x128xbf16>,
      %cst_79 = arith.constant -1.000000e+30 : f32
      %147 = vector.broadcast %cst_79 : f32 to vector<4x1xf32>
      %c0_80 = arith.constant 0 : index
      %c0_81 = arith.constant 0 : index
      %148 = vector.load %arg24[%c0_80, %c0_81] : memref<4x1xf32, #tpu.memory_space<vmem>>, vector<4x1xf32>
      tpu.vector_store %arg24[%c0_80, %c0_81], %147 {strides = array<i32>} : memref<4x1xf32, #tpu.memory_space<vmem>>, vector<4x1xf32>,
      %cst_82 = arith.constant 0.000000e+00 : f32
      %149 = vector.broadcast %cst_82 : f32 to vector<4x1xf32>
      %c0_83 = arith.constant 0 : index
      %c0_84 = arith.constant 0 : index
      %150 = vector.load %arg25[%c0_83, %c0_84] : memref<4x1xf32, #tpu.memory_space<vmem>>, vector<4x1xf32>
      tpu.vector_store %arg25[%c0_83, %c0_84], %149 {strides = array<i32>} : memref<4x1xf32, #tpu.memory_space<vmem>>, vector<4x1xf32>,
    } else {
    }
    %c256_i32 = arith.constant 256 : i32
    %3 = arith.muli %arg1, %c256_i32 : i32
    %4 = tpu.assume_multiple %3, 256 : i32
    %c0 = arith.constant 0 : index
    %c0_1 = arith.constant 0 : index
    %5 = vector.load %arg23[%c0, %c0_1] : memref<4x128xbf16, #tpu.memory_space<vmem>>, vector<4x128xbf16>
    %c0_2 = arith.constant 0 : index
    %c0_3 = arith.constant 0 : index
    %6 = vector.load %arg17[%c0_2, %c0_3] : memref<128x256xbf16, #tpu.memory_space<vmem>>, vector<128x256xbf16>
    %cst = arith.constant dense<0.000000e+00> : vector<4x256xf32>
    %7 = tpu.matmul %5, %6, %cst {dimension_numbers = #tpu.dot_dimension_numbers<[1], [0], [0], [1], [0, 0, 1, 1], [], []>} : vector<4x128xbf16>, vector<128x256xbf16>, vector<4x256xf32> -> vector<4x256xf32>
    %c0_4 = arith.constant 0 : index
    %8 = arith.index_cast %4 : i32 to index
    %9 = vector.load %arg18[%c0_4, %8] : memref<1x256xf32, #tpu.memory_space<vmem>>, vector<1x256xf32>
    %10 = vector.broadcast %9 : vector<1x256xf32> to vector<4x256xf32>
    %11 = arith.addf %7, %10 : vector<4x256xf32>
    %c0_5 = arith.constant 0 : index
    %12 = arith.index_cast %4 : i32 to index
    %13 = vector.load %arg19[%c0_5, %12] : memref<4x256xf32, #tpu.memory_space<vmem>>, vector<4x256xf32>
    tpu.vector_store %arg19[%c0_5, %12], %11 {strides = array<i32>} : memref<4x256xf32, #tpu.memory_space<vmem>>, vector<4x256xf32>,
    %c0_6 = arith.constant 0 : index
    %c0_7 = arith.constant 0 : index
    %14 = vector.load %arg24[%c0_6, %c0_7] : memref<4x1xf32, #tpu.memory_space<vmem>>, vector<4x1xf32>
    %cst_8 = arith.constant dense<0xFF800000> : vector<4xf32>
    %15 = vector.multi_reduction <maximumf>, %11, %cst_8 [1] : vector<4x256xf32> to vector<4xf32>
    %16 = vector.shape_cast %15 : vector<4xf32> to vector<4x1xf32>
    %17 = arith.maximumf %14, %16 : vector<4x1xf32>
    %c0_9 = arith.constant 0 : index
    %c0_10 = arith.constant 0 : index
    %18 = vector.load %arg25[%c0_9, %c0_10] : memref<4x1xf32, #tpu.memory_space<vmem>>, vector<4x1xf32>
    %19 = arith.subf %14, %17 : vector<4x1xf32>
    %20 = math.exp %19 : vector<4x1xf32>
    %21 = arith.mulf %18, %20 : vector<4x1xf32>
    %22 = vector.broadcast %17 : vector<4x1xf32> to vector<4x256xf32>
    %23 = arith.subf %11, %22 : vector<4x256xf32>
    %24 = math.exp %23 : vector<4x256xf32>
    %cst_11 = arith.constant dense<0.000000e+00> : vector<4xf32>
    %25 = vector.multi_reduction <add>, %24, %cst_11 [1] : vector<4x256xf32> to vector<4xf32>
    %26 = vector.shape_cast %25 : vector<4xf32> to vector<4x1xf32>
    %27 = arith.addf %21, %26 : vector<4x1xf32>
    %c0_12 = arith.constant 0 : index
    %c0_13 = arith.constant 0 : index
    %28 = vector.load %arg25[%c0_12, %c0_13] : memref<4x1xf32, #tpu.memory_space<vmem>>, vector<4x1xf32>
    tpu.vector_store %arg25[%c0_12, %c0_13], %27 {strides = array<i32>} : memref<4x1xf32, #tpu.memory_space<vmem>>, vector<4x1xf32>,
    %c0_14 = arith.constant 0 : index
    %c0_15 = arith.constant 0 : index
    %29 = vector.load %arg24[%c0_14, %c0_15] : memref<4x1xf32, #tpu.memory_space<vmem>>, vector<4x1xf32>
    tpu.vector_store %arg24[%c0_14, %c0_15], %17 {strides = array<i32>} : memref<4x1xf32, #tpu.memory_space<vmem>>, vector<4x1xf32>,
    %c0_i32_16 = arith.constant 0 : i32
    %30 = arith.cmpi eq, %arg1, %c0_i32_16 : i32
    %31 = arith.extui %30 : i1 to i32
    %c0_i32_17 = arith.constant 0 : i32
    %32 = arith.cmpi ne, %31, %c0_i32_17 : i32
    scf.if %32 {
      %c0_18 = arith.constant 0 : index
      %c0_19 = arith.constant 0 : index
      %33 = vector.load %arg24[%c0_18, %c0_19] : memref<4x1xf32, #tpu.memory_space<vmem>>, vector<4x1xf32>
      %c0_20 = arith.constant 0 : index
      %c0_21 = arith.constant 0 : index
      %34 = vector.load %arg25[%c0_20, %c0_21] : memref<4x1xf32, #tpu.memory_space<vmem>>, vector<4x1xf32>
      %35 = math.log %34 : vector<4x1xf32>
      %36 = arith.addf %33, %35 : vector<4x1xf32>
      %c0_22 = arith.constant 0 : index
      %c0_23 = arith.constant 0 : index
      %37 = vector.load %arg19[%c0_22, %c0_23] : memref<4x256xf32, #tpu.memory_space<vmem>>, vector<4x256xf32>
      %38 = vector.broadcast %36 : vector<4x1xf32> to vector<4x256xf32>
      %39 = arith.subf %37, %38 : vector<4x256xf32>
      %c0_24 = arith.constant 0 : index
      %c0_25 = arith.constant 0 : index
      %40 = vector.load %arg19[%c0_24, %c0_25] : memref<4x256xf32, #tpu.memory_space<vmem>>, vector<4x256xf32>
      tpu.vector_store %arg19[%c0_24, %c0_25], %39 {strides = array<i32>} : memref<4x256xf32, #tpu.memory_space<vmem>>, vector<4x256xf32>,
    } else {
    }
    return
  }
  func.func @transform_0(%arg0: i32, %arg1: i32) -> (i32, i32) {
    %c0_i32 = arith.constant 0 : i32
    %c0_i32_0 = arith.constant 0 : i32
    return %arg0, %c0_i32 : i32, i32
  }
  func.func @transform_1(%arg0: i32, %arg1: i32) -> (i32, i32) {
    %c0_i32 = arith.constant 0 : i32
    %c0_i32_0 = arith.constant 0 : i32
    return %arg0, %c0_i32 : i32, i32
  }
  func.func @transform_2(%arg0: i32, %arg1: i32) -> (i32, i32) {
    %c0_i32 = arith.constant 0 : i32
    %c0_i32_0 = arith.constant 0 : i32
    return %arg0, %c0_i32 : i32, i32
  }
  func.func @transform_3(%arg0: i32, %arg1: i32) -> (i32, i32) {
    %c0_i32 = arith.constant 0 : i32
    %c0_i32_0 = arith.constant 0 : i32
    return %arg0, %c0_i32 : i32, i32
  }
  func.func @transform_4(%arg0: i32, %arg1: i32) -> (i32, i32, i32) {
    %c0_i32 = arith.constant 0 : i32
    %c0_i32_0 = arith.constant 0 : i32
    %c0_i32_1 = arith.constant 0 : i32
    return %arg0, %c0_i32, %c0_i32_0 : i32, i32, i32
  }
  func.func @transform_5(%arg0: i32, %arg1: i32) -> (i32, i32) {
    %c0_i32 = arith.constant 0 : i32
    %c0_i32_0 = arith.constant 0 : i32
    %c0_i32_1 = arith.constant 0 : i32
    return %c0_i32, %c0_i32_0 : i32, i32
  }
  func.func @transform_6(%arg0: i32, %arg1: i32) -> (i32, i32) {
    %c0_i32 = arith.constant 0 : i32
    %c0_i32_0 = arith.constant 0 : i32
    %c0_i32_1 = arith.constant 0 : i32
    return %c0_i32, %c0_i32_0 : i32, i32
  }
  func.func @transform_7(%arg0: i32, %arg1: i32) -> (i32, i32) {
    %c0_i32 = arith.constant 0 : i32
    %c0_i32_0 = arith.constant 0 : i32
    %c0_i32_1 = arith.constant 0 : i32
    return %c0_i32, %c0_i32_0 : i32, i32
  }
  func.func @transform_8(%arg0: i32, %arg1: i32) -> (i32, i32) {
    %c0_i32 = arith.constant 0 : i32
    %c0_i32_0 = arith.constant 0 : i32
    %c0_i32_1 = arith.constant 0 : i32
    return %c0_i32, %c0_i32_0 : i32, i32
  }
  func.func @transform_9(%arg0: i32, %arg1: i32) -> (i32, i32) {
    %c0_i32 = arith.constant 0 : i32
    %c0_i32_0 = arith.constant 0 : i32
    %c0_i32_1 = arith.constant 0 : i32
    return %c0_i32, %c0_i32_0 : i32, i32
  }
  func.func @transform_10(%arg0: i32, %arg1: i32) -> (i32, i32) {
    %c0_i32 = arith.constant 0 : i32
    %c0_i32_0 = arith.constant 0 : i32
    %c0_i32_1 = arith.constant 0 : i32
    return %c0_i32, %c0_i32_0 : i32, i32
  }
  func.func @transform_11(%arg0: i32, %arg1: i32) -> (i32, i32) {
    %c0_i32 = arith.constant 0 : i32
    %c0_i32_0 = arith.constant 0 : i32
    %c0_i32_1 = arith.constant 0 : i32
    return %c0_i32, %c0_i32_0 : i32, i32
  }
  func.func @transform_12(%arg0: i32, %arg1: i32) -> (i32, i32) {
    %c0_i32 = arith.constant 0 : i32
    %c0_i32_0 = arith.constant 0 : i32
    %c0_i32_1 = arith.constant 0 : i32
    return %c0_i32, %c0_i32_0 : i32, i32
  }
  func.func @transform_13(%arg0: i32, %arg1: i32) -> (i32, i32) {
    %c0_i32 = arith.constant 0 : i32
    %c0_i32_0 = arith.constant 0 : i32
    %c0_i32_1 = arith.constant 0 : i32
    return %c0_i32, %c0_i32_0 : i32, i32
  }
  func.func @transform_14(%arg0: i32, %arg1: i32) -> (i32, i32) {
    %c0_i32 = arith.constant 0 : i32
    %c0_i32_0 = arith.constant 0 : i32
    %c0_i32_1 = arith.constant 0 : i32
    return %c0_i32, %c0_i32_0 : i32, i32
  }
  func.func @transform_15(%arg0: i32, %arg1: i32) -> (i32, i32) {
    %c0_i32 = arith.constant 0 : i32
    %c0_i32_0 = arith.constant 0 : i32
    return %c0_i32, %arg1 : i32, i32
  }
  func.func @transform_16(%arg0: i32, %arg1: i32) -> (i32, i32) {
    %c0_i32 = arith.constant 0 : i32
    %c0_i32_0 = arith.constant 0 : i32
    %c0_i32_1 = arith.constant 0 : i32
    return %c0_i32, %c0_i32_0 : i32, i32
  }
  func.func @transform_17(%arg0: i32, %arg1: i32) -> (i32, i32) {
    %c0_i32 = arith.constant 0 : i32
    %c0_i32_0 = arith.constant 0 : i32
    return %arg0, %c0_i32 : i32, i32
  }
  func.func @transform_18(%arg0: i32, %arg1: i32) -> (i32, i32) {
    %c0_i32 = arith.constant 0 : i32
    %c0_i32_0 = arith.constant 0 : i32
    return %arg0, %c0_i32 : i32, i32
  }
  func.func @transform_19(%arg0: i32, %arg1: i32) -> (i32, i32) {
    %c0_i32 = arith.constant 0 : i32
    %c0_i32_0 = arith.constant 0 : i32
    return %arg0, %c0_i32 : i32, i32
  }
  func.func @transform_20(%arg0: i32, %arg1: i32) -> (i32, i32) {
    %c0_i32 = arith.constant 0 : i32
    %c0_i32_0 = arith.constant 0 : i32
    return %arg0, %c0_i32 : i32, i32
  }
}

</mosaic_0001>

<bundles_post_ra>
// kernel: tpu_custom_call.1
= control target key start
LH: loop header
LB: loop body
LE: loop exit
PB: predicated region body
PF: predicated region fallthrough
CT: control target
= control target key end

     0   :  { %s4426_s0 = inlined_call_operand.hbm [shape: f32[4,128], index: 0, kind: input, shape index: {}]   ;;  %s4427_s1 = inlined_call_operand.hbm [shape: f32[4,128], index: 1, kind: input, shape index: {}]   ;;  %s4428_s2 = inlined_call_operand.hbm [shape: f32[4,128], index: 2, kind: input, shape index: {}]   ;;  %s4429_s3 = inlined_call_operand.hbm [shape: f32[4,128], index: 3, kind: input, shape index: {}]   ;;  %s4430_s4 = inlined_call_operand.hbm [shape: f32[4,16,128], index: 4, kind: input, shape index: {}]   ;;  %s4431_s5 = inlined_call_operand.hbm [shape: f32[128,128], index: 5, kind: input, shape index: {}]   ;;  %s4432_s6 = inlined_call_operand.hbm [shape: f32[128,128], index: 6, kind: input, shape index: {}]   ;;  %s4433_s7 = inlined_call_operand.hbm [shape: f32[1,128], index: 7, kind: input, shape index: {}]   ;;  %s4434_s8 = inlined_call_operand.hbm [shape: f32[128,128], index: 8, kind: input, shape index: {}]   ;;  %s4435_s9 = inlined_call_operand.hbm [shape: f32[128,128], index: 9, kind: input, shape index: {}]   ;;  %s4436_s10 = inlined_call_operand.hbm [shape: f32[1,128], index: 10, kind: input, shape index: {}]   ;;  %s4437_s11 = inlined_call_operand.hbm [shape: f32[128,128], index: 11, kind: input, shape index: {}]   ;;  %s4438_s12 = inlined_call_operand.hbm [shape: f32[128,512], index: 12, kind: input, shape index: {}]   ;;  %s4439_s13 = inlined_call_operand.hbm [shape: f32[128,512], index: 13, kind: input, shape index: {}]   ;;  %s4440_s14 = inlined_call_operand.hbm [shape: f32[1,512], index: 14, kind: input, shape index: {}]   ;;  %s4441_s15 = inlined_call_operand.hbm [shape: bf16[128,256], index: 15, kind: input, shape index: {}]   ;;  %s4442_s16 = inlined_call_operand.hbm [shape: f32[1,256], index: 16, kind: input, shape index: {}]   ;;  %s4443_s17 = inlined_call_operand.hbm [shape: f32[4,256], index: 17, kind: output, shape index: {0}]   ;;  %s4444_s18 = inlined_call_operand.hbm [shape: f32[4,128], index: 18, kind: output, shape index: {1}]   ;;  %s4445_s19 = inlined_call_operand.hbm [shape: f32[4,128], index: 19, kind: output, shape index: {2}]   ;;  %s4446_s20 = inlined_call_operand.hbm [shape: f32[4,16], index: 20, kind: output, shape index: {3}]  }
   0x1   :  { %4472 = sst [smem:[#allocation67_spill]] %s4426_s0 }
   0x2   :  { %4473 = sst [smem:[#allocation68_spill]] %s4427_s1 }
   0x3   :  { %4474 = sst [smem:[#allocation69_spill]] %s4428_s2 }
   0x4   :  { %4475 = sst [smem:[#allocation70_spill]] %s4429_s3 }
   0x5   :  { %4476 = sst [smem:[#allocation71_spill]] %s4430_s4 }
   0x6   :  { %26 = vsyncpa [#allocation6], 0 }
   0x7   :  { %27 = vsyncpa [#allocation9], 0 }
   0x8   :  { %28 = vsyncpa [#allocation12], 0 }
   0x9   :  { %29 = vsyncpa [#allocation15], 0 }
   0xa   :  { %30 = vsyncpa [#allocation18], 0 }
   0xb   :  { %31 = vsyncpa [#allocation21], 0 }
   0xc   :  { %32 = vsyncpa [#allocation24], 0 }
   0xd   :  { %33 = vsyncpa [#allocation27], 0 }
   0xe   :  { %34 = vsyncpa [#allocation30], 0 }
   0xf   :  { %35 = vsyncpa [#allocation7], 0 }
  0x10   :  { %36 = vsyncpa [#allocation34], 0 }
  0x11   :  { %37 = vsyncpa [#allocation37], 0  ;;  %s3491_s1 = smov [#allocation8]   ;;  %s3492_s23 = smov [#allocation11]  }
  0x12   :  { %s54_s22 = sshll.u32 %s3491_s1, 4  ;;  %s74_s24 = sshll.u32 %s3492_s23, 4  ;;  %s55_s22 = int_to_ptr.vmem [resolvable:$true] %s54_s22  ;;  %s75_s24 = int_to_ptr.vmem [resolvable:$true] %s74_s24 }
  0x13   :  { %s4477_s3 = sld [smem:[#allocation68_spill]] }
  0x19   :  { %s3005_s26 = scalar_lea.hbm %s4477_s3, 64 }
  0x1a   :  { %p3006_p0 = scmp.ne.s32.totalorder %s4477_s3, %s3005_s26  ;;  %p3009_p1 = scmp.lt.u32.totalorder %s3005_s26, %s4477_s3 }
  0x1c   :  { %p3011_p2 = pnand %p3009_p1, %p3006_p0 }
  0x1e   :  { %3014 = shalt.err (!%p3011_p2)
}
  0x1f   :  { %s3015_s30 = scalar_lea.vmem %s55_s22, 64  ;;  %p3020_p4 = scmp.lt.s32.totalorder %s55_s22, %s55_s22 }
  0x20   :  { %p3016_p3 = scmp.ne.s32.totalorder %s55_s22, %s3015_s30  ;;  %p3021_p5 = scmp.lt.s32.totalorder %s3015_s30, %s3015_s30 }
  0x22   :  { %p3022_p6 = por %p3021_p5, %p3020_p4 }
  0x24   :  { %p3023_p7 = pnand %p3022_p6, %p3016_p3 }
  0x26   :  { %3026 = shalt.err (!%p3023_p7)
}
  0x27   :  { %57 = dma.hbm_to_vmem [thread:$0]  %s4477_s3, 64, %s55_s22, [#allocation9]  }
  0x28   :  { %s4478_s2 = sld [smem:[#allocation70_spill]] }
  0x2e   :  { %s3027_s25 = scalar_lea.hbm %s4478_s2, 64 }
  0x2f   :  { %p3028_p8 = scmp.ne.s32.totalorder %s4478_s2, %s3027_s25  ;;  %p3031_p9 = scmp.lt.u32.totalorder %s3027_s25, %s4478_s2 }
  0x31   :  { %p3033_p10 = pnand %p3031_p9, %p3028_p8 }
  0x33   :  { %3036 = shalt.err (!%p3033_p10)
}
  0x34   :  { %s3037_s29 = scalar_lea.vmem %s75_s24, 64  ;;  %p3042_p12 = scmp.lt.s32.totalorder %s75_s24, %s75_s24 }
  0x35   :  { %p3038_p11 = scmp.ne.s32.totalorder %s75_s24, %s3037_s29  ;;  %p3043_p13 = scmp.lt.s32.totalorder %s3037_s29, %s3037_s29 }
  0x37   :  { %p3044_p0 = por %p3043_p13, %p3042_p12 }
  0x39   :  { %p3045_p1 = pnand %p3044_p0, %p3038_p11 }
  0x3b   :  { %3048 = shalt.err (!%p3045_p1)
}
  0x3c   :  { %77 = dma.hbm_to_vmem [thread:$0]  %s4478_s2, 64, %s75_s24, [#allocation12]  }
  0x3d   :  { %s3493_s30 = smov [#allocation14]   ;;  %s3494_s21 = smov [#allocation17]  }
  0x3e   :  { %s95_s0 = sshll.u32 %s3493_s30, 4  ;;  %s120_s1 = sshll.u32 %s3494_s21, 4  ;;  %s96_s0 = int_to_ptr.vmem [resolvable:$true] %s95_s0  ;;  %s3652_s1 = int_to_ptr.vmem [resolvable:$true] %s120_s1 }
  0x3f   :  { %s3049_s27 = scalar_lea.hbm %s4431_s5, 2048 }
  0x40   :  { %p3050_p2 = scmp.ne.s32.totalorder %s4431_s5, %s3049_s27  ;;  %p3053_p3 = scmp.lt.u32.totalorder %s3049_s27, %s4431_s5 }
  0x42   :  { %p3055_p4 = pnand %p3053_p3, %p3050_p2 }
  0x44   :  { %3058 = shalt.err (!%p3055_p4)
}
  0x45   :  { %s3059_s24 = scalar_lea.vmem %s96_s0, 2048  ;;  %p3064_p6 = scmp.lt.s32.totalorder %s96_s0, %s96_s0 }
  0x46   :  { %p3060_p5 = scmp.ne.s32.totalorder %s96_s0, %s3059_s24  ;;  %p3065_p7 = scmp.lt.s32.totalorder %s3059_s24, %s3059_s24 }
  0x48   :  { %p3066_p8 = por %p3065_p7, %p3064_p6 }
  0x4a   :  { %p3067_p9 = pnand %p3066_p8, %p3060_p5 }
  0x4c   :  { %3070 = shalt.err (!%p3067_p9)
}
  0x4d   :  { %s3495_s2 = smov 128   ;;  %s3496_s22 = smov 8  }
  0x4e   :  { %101 = dma.hbm_to_vmem [thread:$0]  %s4431_s5, 2048, %s96_s0, [#allocation15], %s3495_s2, %s3495_s2, %s3496_s22  }
  0x4f   :  { %s3071_s25 = scalar_lea.hbm %s4433_s7, 16 }
  0x50   :  { %p3072_p10 = scmp.ne.s32.totalorder %s4433_s7, %s3071_s25  ;;  %p3075_p11 = scmp.lt.u32.totalorder %s3071_s25, %s4433_s7 }
  0x52   :  { %p3077_p12 = pnand %p3075_p11, %p3072_p10 }
  0x54   :  { %3080 = shalt.err (!%p3077_p12)
}
  0x55   :  { %s3081_s29 = scalar_lea.vmem %s3652_s1, 16  ;;  %s3085_s5 = scalar_lea.vmem %s3652_s1, 32 }
  0x56   :  { %p3082_p13 = scmp.ne.s32.totalorder %s3652_s1, %s3081_s29  ;;  %p3086_p0 = scmp.lt.s32.totalorder %s3652_s1, %s3652_s1 }
  0x57   :  { %p3087_p1 = scmp.lt.s32.totalorder %s3085_s5, %s3081_s29 }
  0x59   :  { %p3088_p2 = por %p3087_p1, %p3086_p0 }
  0x5b   :  { %p3089_p3 = pnand %p3088_p2, %p3082_p13 }
  0x5d   :  { %3092 = shalt.err (!%p3089_p3)
}
  0x5e   :  { %123 = dma.hbm_to_vmem [thread:$0]  %s4433_s7, 16, %s3652_s1, [#allocation18]  }
  0x5f   :  { %s3497_s3 = smov [#allocation20]   ;;  %s3498_s21 = smov [#allocation23]  }
  0x60   :  { %s141_s30 = sshll.u32 %s3497_s3, 4  ;;  %s163_s23 = sshll.u32 %s3498_s21, 4  ;;  %s142_s30 = int_to_ptr.vmem [resolvable:$true] %s141_s30  ;;  %s3687_s23 = int_to_ptr.vmem [resolvable:$true] %s163_s23 }
  0x61   :  { %s3093_s28 = scalar_lea.hbm %s4435_s9, 2048 }
  0x62   :  { %p3094_p4 = scmp.ne.s32.totalorder %s4435_s9, %s3093_s28  ;;  %p3097_p5 = scmp.lt.u32.totalorder %s3093_s28, %s4435_s9 }
  0x64   :  { %p3099_p6 = pnand %p3097_p5, %p3094_p4 }
  0x66   :  { %3102 = shalt.err (!%p3099_p6)
}
  0x67   :  { %s3103_s7 = scalar_lea.vmem %s142_s30, 2048  ;;  %p3108_p8 = scmp.lt.s32.totalorder %s142_s30, %s142_s30 }
  0x68   :  { %p3104_p7 = scmp.ne.s32.totalorder %s142_s30, %s3103_s7  ;;  %p3109_p9 = scmp.lt.s32.totalorder %s3103_s7, %s3103_s7 }
  0x6a   :  { %p3110_p10 = por %p3109_p9, %p3108_p8 }
  0x6c   :  { %p3111_p11 = pnand %p3110_p10, %p3104_p7 }
  0x6e   :  { %3114 = shalt.err (!%p3111_p11)
}
  0x6f   :  { %147 = dma.hbm_to_vmem [thread:$0]  %s4435_s9, 2048, %s142_s30, [#allocation21], %s3495_s2, %s3495_s2, %s3496_s22  }
  0x70   :  { %s3115_s21 = scalar_lea.hbm %s4437_s11, 2048 }
  0x71   :  { %p3116_p12 = scmp.ne.s32.totalorder %s4437_s11, %s3115_s21  ;;  %p3119_p13 = scmp.lt.u32.totalorder %s3115_s21, %s4437_s11 }
  0x73   :  { %p3121_p0 = pnand %p3119_p13, %p3116_p12 }
  0x75   :  { %3124 = shalt.err (!%p3121_p0)
}
  0x76   :  { %s3125_s4 = scalar_lea.vmem %s3687_s23, 2048  ;;  %p3130_p2 = scmp.lt.s32.totalorder %s3687_s23, %s3687_s23 }
  0x77   :  { %p3126_p1 = scmp.ne.s32.totalorder %s3687_s23, %s3125_s4  ;;  %p3131_p3 = scmp.lt.s32.totalorder %s3125_s4, %s3125_s4 }
  0x79   :  { %p3132_p4 = por %p3131_p3, %p3130_p2 }
  0x7b   :  { %p3133_p5 = pnand %p3132_p4, %p3126_p1 }
  0x7d   :  { %3136 = shalt.err (!%p3133_p5)
}
  0x7e   :  { %169 = dma.hbm_to_vmem [thread:$0]  %s4437_s11, 2048, %s3687_s23, [#allocation24], %s3495_s2, %s3495_s2, %s3496_s22  }
  0x7f   :  { %s3499_s29 = smov [#allocation26]   ;;  %s3500_s7 = smov [#allocation29]  }
  0x80   :  { %s187_s5 = sshll.u32 %s3499_s29, 4  ;;  %s209_s1 = sshll.u32 %s3500_s7, 4  ;;  %s188_s5 = int_to_ptr.vmem [resolvable:$true] %s187_s5  ;;  %s3724_s1 = int_to_ptr.vmem [resolvable:$true] %s209_s1 }
  0x81   :  { %s3137_s3 = scalar_lea.hbm %s4439_s13, 8192 }
  0x82   :  { %p3138_p6 = scmp.ne.s32.totalorder %s4439_s13, %s3137_s3  ;;  %p3141_p7 = scmp.lt.u32.totalorder %s3137_s3, %s4439_s13 }
  0x84   :  { %p3143_p8 = pnand %p3141_p7, %p3138_p6 }
  0x86   :  { %3146 = shalt.err (!%p3143_p8)
}
  0x87   :  { %s3147_s11 = scalar_lea.vmem %s188_s5, 8192  ;;  %p3152_p10 = scmp.lt.s32.totalorder %s188_s5, %s188_s5 }
  0x88   :  { %p3148_p9 = scmp.ne.s32.totalorder %s188_s5, %s3147_s11  ;;  %p3153_p11 = scmp.lt.s32.totalorder %s3147_s11, %s3147_s11 }
  0x8a   :  { %p3154_p12 = por %p3153_p11, %p3152_p10 }
  0x8c   :  { %p3155_p13 = pnand %p3154_p12, %p3148_p9 }
  0x8e   :  { %3158 = shalt.err (!%p3155_p13)
}
  0x8f   :  { %s3501_s23 = smov 512   ;;  %s3502_s26 = smov 32  }
  0x90   :  { %193 = dma.hbm_to_vmem [thread:$0]  %s4439_s13, 8192, %s188_s5, [#allocation27], %s3501_s23, %s3501_s23, %s3502_s26  }
  0x91   :  { %s3159_s7 = scalar_lea.hbm %s4441_s15, 2048 }
  0x92   :  { %p3160_p0 = scmp.ne.s32.totalorder %s4441_s15, %s3159_s7  ;;  %p3163_p1 = scmp.lt.u32.totalorder %s3159_s7, %s4441_s15 }
  0x94   :  { %p3165_p2 = pnand %p3163_p1, %p3160_p0 }
  0x96   :  { %3168 = shalt.err (!%p3165_p2)
}
  0x97   :  { %s3169_s25 = scalar_lea.vmem %s3724_s1, 2048  ;;  %p3174_p4 = scmp.lt.s32.totalorder %s3724_s1, %s3724_s1 }
  0x98   :  { %p3170_p3 = scmp.ne.s32.totalorder %s3724_s1, %s3169_s25  ;;  %p3175_p5 = scmp.lt.s32.totalorder %s3169_s25, %s3169_s25 }
  0x9a   :  { %p3176_p6 = por %p3175_p5, %p3174_p4 }
  0x9c   :  { %p3177_p7 = pnand %p3176_p6, %p3170_p3 }
  0x9e   :  { %3180 = shalt.err (!%p3177_p7)
}
  0x9f   :  { %215 = dma.hbm_to_vmem [thread:$0]  %s4441_s15, 2048, %s3724_s1, [#allocation30], %s3495_s2, %s3495_s2, %s3496_s22  }
  0xa0   :  { %s3503_s27 = smov [#allocation5]   ;;  %s3504_s11 = smov [#allocation10]  }
  0xa1   :  { %s44_s28 = sshll.u32 %s3503_s27, 4  ;;  %s64_s4 = sshll.u32 %s3504_s11, 4  ;;  %s45_s28 = int_to_ptr.vmem [resolvable:$true] %s44_s28  ;;  %s65_s4 = int_to_ptr.vmem [resolvable:$true] %s64_s4 }
  0xa2   :  { %s4479_s29 = sld [smem:[#allocation67_spill]] }
  0xa8   :  { %s3181_s7 = scalar_lea.hbm %s4479_s29, 64 }
  0xa9   :  { %p3182_p8 = scmp.ne.s32.totalorder %s4479_s29, %s3181_s7  ;;  %p3185_p9 = scmp.lt.u32.totalorder %s3181_s7, %s4479_s29 }
  0xab   :  { %p3187_p10 = pnand %p3185_p9, %p3182_p8 }
  0xad   :  { %3190 = shalt.err (!%p3187_p10)
}
  0xae   :  { %s3191_s15 = scalar_lea.vmem %s45_s28, 64  ;;  %p3196_p12 = scmp.lt.s32.totalorder %s45_s28, %s45_s28 }
  0xaf   :  { %p3192_p11 = scmp.ne.s32.totalorder %s45_s28, %s3191_s15  ;;  %p3197_p13 = scmp.lt.s32.totalorder %s3191_s15, %s3191_s15 }
  0xb1   :  { %p3198_p0 = por %p3197_p13, %p3196_p12 }
  0xb3   :  { %p3199_p1 = pnand %p3198_p0, %p3192_p11 }
  0xb5   :  { %3202 = shalt.err (!%p3199_p1)
}
  0xb6   :  { %47 = dma.hbm_to_vmem [thread:$0]  %s4479_s29, 64, %s45_s28, [#allocation6]  }
  0xb7   :  { %s4480_s27 = sld [smem:[#allocation69_spill]] }
  0xbd   :  { %s3203_s11 = scalar_lea.hbm %s4480_s27, 64 }
  0xbe   :  { %p3204_p2 = scmp.ne.s32.totalorder %s4480_s27, %s3203_s11  ;;  %p3207_p3 = scmp.lt.u32.totalorder %s3203_s11, %s4480_s27 }
  0xc0   :  { %p3209_p4 = pnand %p3207_p3, %p3204_p2 }
  0xc2   :  { %3212 = shalt.err (!%p3209_p4)
}
  0xc3   :  { %s3213_s24 = scalar_lea.vmem %s65_s4, 64  ;;  %p3218_p6 = scmp.lt.s32.totalorder %s65_s4, %s65_s4 }
  0xc4   :  { %p3214_p5 = scmp.ne.s32.totalorder %s65_s4, %s3213_s24  ;;  %p3219_p7 = scmp.lt.s32.totalorder %s3213_s24, %s3213_s24 }
  0xc6   :  { %p3220_p8 = por %p3219_p7, %p3218_p6 }
  0xc8   :  { %p3221_p9 = pnand %p3220_p8, %p3214_p5 }
  0xca   :  { %3224 = shalt.err (!%p3221_p9)
}
  0xcb   :  { %67 = dma.hbm_to_vmem [thread:$0]  %s4480_s27, 64, %s65_s4, [#allocation9]  }
  0xcc   :  { %s3505_s3 = smov [#allocation13]   ;;  %s3506_s15 = smov [#allocation16]  }
  0xcd   :  { %s83_s21 = sshll.u32 %s3505_s3, 4  ;;  %s107_s1 = sshll.u32 %s3506_s15, 4  ;;  %s84_s21 = int_to_ptr.vmem [resolvable:$true] %s83_s21  ;;  %s3785_s1 = int_to_ptr.vmem [resolvable:$true] %s107_s1 }
  0xce   :  { %s4481_s5 = sld [smem:[#allocation71_spill]] }
  0xd4   :  { %s3225_s11 = scalar_lea.hbm %s4481_s5, 1024 }
  0xd5   :  { %p3226_p10 = scmp.ne.s32.totalorder %s4481_s5, %s3225_s11  ;;  %p3229_p11 = scmp.lt.u32.totalorder %s3225_s11, %s4481_s5 }
  0xd7   :  { %p3231_p12 = pnand %p3229_p11, %p3226_p10 }
  0xd9   :  { %3234 = shalt.err (!%p3231_p12)
}
  0xda   :  { %s3235_s4 = scalar_lea.vmem %s84_s21, 1024  ;;  %p3240_p0 = scmp.lt.s32.totalorder %s84_s21, %s84_s21 }
  0xdb   :  { %p3236_p13 = scmp.ne.s32.totalorder %s84_s21, %s3235_s4  ;;  %p3241_p1 = scmp.lt.s32.totalorder %s3235_s4, %s3235_s4 }
  0xdd   :  { %p3242_p2 = por %p3241_p1, %p3240_p0 }
  0xdf   :  { %p3243_p3 = pnand %p3242_p2, %p3236_p13 }
  0xe1   :  { %3246 = shalt.err (!%p3243_p3)
}
  0xe2   :  { %89 = dma.hbm_to_vmem [thread:$0]  %s4481_s5, 1024, %s84_s21, [#allocation12], %s3495_s2, %s3495_s2, %s3496_s22  }
  0xe3   :  { %s3247_s3 = scalar_lea.hbm %s4432_s6, 2048 }
  0xe4   :  { %p3248_p4 = scmp.ne.s32.totalorder %s4432_s6, %s3247_s3  ;;  %p3251_p5 = scmp.lt.u32.totalorder %s3247_s3, %s4432_s6 }
  0xe6   :  { %p3253_p6 = pnand %p3251_p5, %p3248_p4 }
  0xe8   :  { %3256 = shalt.err (!%p3253_p6)
}
  0xe9   :  { %s3257_s9 = scalar_lea.vmem %s3785_s1, 2048  ;;  %p3262_p8 = scmp.lt.s32.totalorder %s3785_s1, %s3785_s1 }
  0xea   :  { %p3258_p7 = scmp.ne.s32.totalorder %s3785_s1, %s3257_s9  ;;  %p3263_p9 = scmp.lt.s32.totalorder %s3257_s9, %s3257_s9 }
  0xec   :  { %p3264_p10 = por %p3263_p9, %p3262_p8 }
  0xee   :  { %p3265_p11 = pnand %p3264_p10, %p3258_p7 }
  0xf0   :  { %3268 = shalt.err (!%p3265_p11)
}
  0xf1   :  { %113 = dma.hbm_to_vmem [thread:$0]  %s4432_s6, 2048, %s3785_s1, [#allocation15], %s3495_s2, %s3495_s2, %s3496_s22  }
  0xf2   :  { %s3507_s30 = smov [#allocation19]   ;;  %s3508_s0 = smov [#allocation22]  }
  0xf3   :  { %s129_s7 = sshll.u32 %s3507_s30, 4  ;;  %s154_s4 = sshll.u32 %s3508_s0, 4  ;;  %s130_s7 = int_to_ptr.vmem [resolvable:$true] %s129_s7  ;;  %s155_s4 = int_to_ptr.vmem [resolvable:$true] %s154_s4 }
  0xf4   :  { %s3269_s28 = scalar_lea.hbm %s4434_s8, 2048 }
  0xf5   :  { %p3270_p12 = scmp.ne.s32.totalorder %s4434_s8, %s3269_s28  ;;  %p3273_p13 = scmp.lt.u32.totalorder %s3269_s28, %s4434_s8 }
  0xf7   :  { %p3275_p0 = pnand %p3273_p13, %p3270_p12 }
  0xf9   :  { %3278 = shalt.err (!%p3275_p0)
}
  0xfa   :  { %s3279_s6 = scalar_lea.vmem %s130_s7, 2048  ;;  %p3284_p2 = scmp.lt.s32.totalorder %s130_s7, %s130_s7 }
  0xfb   :  { %p3280_p1 = scmp.ne.s32.totalorder %s130_s7, %s3279_s6  ;;  %p3285_p3 = scmp.lt.s32.totalorder %s3279_s6, %s3279_s6 }
  0xfd   :  { %p3286_p4 = por %p3285_p3, %p3284_p2 }
  0xff   :  { %p3287_p5 = pnand %p3286_p4, %p3280_p1 }
 0x101   :  { %3290 = shalt.err (!%p3287_p5)
}
 0x102   :  { %135 = dma.hbm_to_vmem [thread:$0]  %s4434_s8, 2048, %s130_s7, [#allocation18], %s3495_s2, %s3495_s2, %s3496_s22  }
 0x103   :  { %s3291_s21 = scalar_lea.hbm %s4436_s10, 16 }
 0x104   :  { %p3292_p6 = scmp.ne.s32.totalorder %s4436_s10, %s3291_s21  ;;  %p3295_p7 = scmp.lt.u32.totalorder %s3291_s21, %s4436_s10 }
 0x106   :  { %p3297_p8 = pnand %p3295_p7, %p3292_p6 }
 0x108   :  { %3300 = shalt.err (!%p3297_p8)
}
 0x109   :  { %s3301_s24 = scalar_lea.vmem %s155_s4, 16  ;;  %s3305_s28 = scalar_lea.vmem %s155_s4, 32 }
 0x10a   :  { %p3302_p9 = scmp.ne.s32.totalorder %s155_s4, %s3301_s24  ;;  %p3306_p10 = scmp.lt.s32.totalorder %s155_s4, %s155_s4 }
 0x10b   :  { %p3307_p11 = scmp.lt.s32.totalorder %s3305_s28, %s3301_s24 }
 0x10d   :  { %p3308_p12 = por %p3307_p11, %p3306_p10 }
 0x10f   :  { %p3309_p13 = pnand %p3308_p12, %p3302_p9 }
 0x111   :  { %3312 = shalt.err (!%p3309_p13)
}
 0x112   :  { %157 = dma.hbm_to_vmem [thread:$0]  %s4436_s10, 16, %s155_s4, [#allocation21]  }
 0x113   :  { %s3509_s22 = smov [#allocation25]   ;;  %s3510_s29 = smov [#allocation28]  }
 0x114   :  { %s175_s7 = sshll.u32 %s3509_s22, 4  ;;  %s200_s3 = sshll.u32 %s3510_s29, 4  ;;  %s176_s7 = int_to_ptr.vmem [resolvable:$true] %s175_s7  ;;  %s201_s3 = int_to_ptr.vmem [resolvable:$true] %s200_s3 }
 0x115   :  { %s3313_s6 = scalar_lea.hbm %s4438_s12, 8192 }
 0x116   :  { %p3314_p0 = scmp.ne.s32.totalorder %s4438_s12, %s3313_s6  ;;  %p3317_p1 = scmp.lt.u32.totalorder %s3313_s6, %s4438_s12 }
 0x118   :  { %p3319_p2 = pnand %p3317_p1, %p3314_p0 }
 0x11a   :  { %3322 = shalt.err (!%p3319_p2)
}
 0x11b   :  { %s3323_s10 = scalar_lea.vmem %s176_s7, 8192  ;;  %p3328_p4 = scmp.lt.s32.totalorder %s176_s7, %s176_s7 }
 0x11c   :  { %p3324_p3 = scmp.ne.s32.totalorder %s176_s7, %s3323_s10  ;;  %p3329_p5 = scmp.lt.s32.totalorder %s3323_s10, %s3323_s10 }
 0x11e   :  { %p3330_p6 = por %p3329_p5, %p3328_p4 }
 0x120   :  { %p3331_p7 = pnand %p3330_p6, %p3324_p3 }
 0x122   :  { %3334 = shalt.err (!%p3331_p7)
}
 0x123   :  { %181 = dma.hbm_to_vmem [thread:$0]  %s4438_s12, 8192, %s176_s7, [#allocation24], %s3501_s23, %s3501_s23, %s3502_s26  }
 0x124   :  { %s3335_s0 = scalar_lea.hbm %s4440_s14, 64 }
 0x125   :  { %p3336_p8 = scmp.ne.s32.totalorder %s4440_s14, %s3335_s0  ;;  %p3339_p9 = scmp.lt.u32.totalorder %s3335_s0, %s4440_s14 }
 0x127   :  { %p3341_p10 = pnand %p3339_p9, %p3336_p8 }
 0x129   :  { %3344 = shalt.err (!%p3341_p10)
}
 0x12a   :  { %s3345_s2 = scalar_lea.vmem %s201_s3, 64  ;;  %p3350_p12 = scmp.lt.s32.totalorder %s201_s3, %s201_s3 }
 0x12b   :  { %p3346_p11 = scmp.ne.s32.totalorder %s201_s3, %s3345_s2  ;;  %p3351_p13 = scmp.lt.s32.totalorder %s3345_s2, %s3345_s2 }
 0x12d   :  { %p3352_p0 = por %p3351_p13, %p3350_p12 }
 0x12f   :  { %p3353_p1 = pnand %p3352_p0, %p3346_p11 }
 0x131   :  { %3356 = shalt.err (!%p3353_p1)
}
 0x132   :  { %203 = dma.hbm_to_vmem [thread:$0]  %s4440_s14, 64, %s201_s3, [#allocation27]  }
 0x133   :  { %s3511_s26 = smov [#allocation31]   ;;  %s3357_s15 = scalar_lea.hbm %s4442_s16, 32 }
 0x134   :  { %s222_s22 = sshll.u32 %s3511_s26, 4  ;;  %p3358_p2 = scmp.ne.s32.totalorder %s4442_s16, %s3357_s15  ;;  %s223_s22 = int_to_ptr.vmem [resolvable:$true] %s222_s22 }
 0x135   :  { %p3361_p3 = scmp.lt.u32.totalorder %s3357_s15, %s4442_s16 }
 0x137   :  { %p3363_p4 = pnand %p3361_p3, %p3358_p2 }
 0x139   :  { %3366 = shalt.err (!%p3363_p4)
}
 0x13a   :  { %s3367_s11 = scalar_lea.vmem %s223_s22, 32  ;;  %p3372_p6 = scmp.lt.s32.totalorder %s223_s22, %s223_s22 }
 0x13b   :  { %p3368_p5 = scmp.ne.s32.totalorder %s223_s22, %s3367_s11  ;;  %p3373_p7 = scmp.lt.s32.totalorder %s3367_s11, %s3367_s11 }
 0x13d   :  { %p3374_p8 = por %p3373_p7, %p3372_p6 }
 0x13f   :  { %p3375_p9 = pnand %p3374_p8, %p3368_p5 }
 0x141   :  { %3378 = shalt.err (!%p3375_p9)
}
 0x142   :  { %225 = dma.hbm_to_vmem [thread:$0]  %s4442_s16, 32, %s223_s22, [#allocation30]  }
 0x143   :  { %3467 = dma.done.wait [#allocation6], 64  }
 0x144   :  { %3468 = vsyncadd [#allocation6], 4294967232 }
 0x145   :  { %3469 = dma.done.wait [#allocation9], 128  }
 0x146   :  { %3470 = vsyncadd [#allocation9], 4294967168 }
 0x147   :  { %3471 = dma.done.wait [#allocation12], 1088  }
 0x148   :  { %3472 = vsyncadd [#allocation12], 4294966208 }
 0x149   :  { %3473 = dma.done.wait [#allocation15], 4096  }
 0x14a   :  { %3474 = vsyncadd [#allocation15], 4294963200 }
 0x14b   :  { %3475 = dma.done.wait [#allocation18], 2064  }
 0x14c   :  { %3476 = vsyncadd [#allocation18], 4294965232 }
 0x14d   :  { %3477 = dma.done.wait [#allocation21], 2064  }
 0x14e   :  { %3478 = vsyncadd [#allocation21], 4294965232 }
 0x14f   :  { %3479 = dma.done.wait [#allocation24], 10240  }
 0x150   :  { %3480 = vsyncadd [#allocation24], 4294957056 }
 0x151   :  { %3481 = dma.done.wait [#allocation27], 8256  }
 0x152   :  { %3482 = vsyncadd [#allocation27], 4294959040 }
 0x153   :  { %3483 = dma.done.wait [#allocation30], 2080  }
 0x154   :  { %3484 = vsyncadd [#allocation30], 4294965216  ;;  %v3512_v0 = vmov 0.0|0.0   ;;  %vm3513_vm0 = vmmov 0   ;;  %v4453_v1 = vmov 0.0   ;;  %v310_v2 = vld [vmem:[#allocation16] sm:$0xff] }
 0x155   :  { %2498 = vmatprep.subr.bf16.mxu0 %v3512_v0  ;;  %2522 = vmatprep.subr.bf16.mxu1 %v3512_v0  ;;  %v311_v3 = vld [vmem:[#allocation16 + $0x8] sm:$0xff]  ;;  %v294_v4 = vld [vmem:[#allocation14] sm:$0xff]  ;;  %v312_v7 = vld [vmem:[#allocation16 + $0x10] sm:$0xff]  ;;  %vm649_vm1 = vcmask 130112   ;;  %vm678_vm2 = vcmask 1041409   ;;  %vm680_vm3 = vcmask 1042434  }
 0x156   :  { %2355 = vmatprep.mubr.msk.f32.mxu0 %vm3513_vm0, %v4453_v1  ;;  %2390 = vmatprep.mubr.msk.f32.mxu1 %vm3513_vm0, %v4453_v1  ;;  %v2499_v5 = vpack.c.bf16 %v311_v3, %v310_v2  ;;  %v295_v6 = vld [vmem:[#allocation14 + $0x8] sm:$0xff]  ;;  %v313_v8 = vld [vmem:[#allocation16 + $0x18] sm:$0xff]  ;;  %v296_v10 = vld [vmem:[#allocation14 + $0x10] sm:$0xff]  ;;  %vm682_vm4 = vcmask 1043459   ;;  %vm685_vm5 = vcmask 125952   ;;  %vm1927_vm6 = vcmask 3072  }
 0x157   :  { %v2523_v9 = vpack.c.bf16 %v295_v6, %v294_v4  ;;  %v297_v11 = vld [vmem:[#allocation14 + $0x18] sm:$0xff]  ;;  %v2502_v12 = vpack.c.bf16 %v313_v8, %v312_v7  ;;  %v314_v14 = vld [vmem:[#allocation16 + $0x20] sm:$0xff]  ;;  %v315_v15 = vld [vmem:[#allocation16 + $0x28] sm:$0xff]  ;;  %vm2092_vm7 = vcmask 1043456   ;;  %s3518_s16 = smov [#allocation33]  }
 0x158   :  { %2500 = vmatpush3.bf16.msra.mxu0 %v2499_v5  ;;  %v2526_v13 = vpack.c.bf16 %v297_v11, %v296_v10  ;;  %v298_v16 = vld [vmem:[#allocation14 + $0x20] sm:$0xff]  ;;  %v299_v17 = vld [vmem:[#allocation14 + $0x28] sm:$0xff]  ;;  %v2505_v18 = vpack.c.bf16 %v315_v15, %v314_v14  ;;  %v316_v20 = vld [vmem:[#allocation16 + $0x30] sm:$0xff]  ;;  %s2163_s9 = sshll.u32 %s3518_s16, 4  ;;  %s2164_s9 = int_to_ptr.vmem [resolvable:$true] %s2163_s9 }
 0x159   :  { %2524 = vmatpush3.bf16.msra.mxu1 %v2523_v9  ;;  %2501 = vmatprep.subr.bf16.mxu0 %v3512_v0  ;;  %v2529_v19 = vpack.c.bf16 %v299_v17, %v298_v16  ;;  %v317_v21 = vld [vmem:[#allocation16 + $0x38] sm:$0xff]  ;;  %v300_v22 = vld [vmem:[#allocation14 + $0x30] sm:$0xff]  ;;  %v318_v26 = vld [vmem:[#allocation16 + $0x40] sm:$0xff]  ;;  %s3379_s10 = scalar_lea.vmem %s2164_s9, 64  ;;  %p3384_p11 = scmp.lt.s32.totalorder %s2164_s9, %s2164_s9 }
 0x15a   :  { %2525 = vmatprep.subr.bf16.mxu1 %v3512_v0  ;;  %v301_v23 = vld [vmem:[#allocation14 + $0x38] sm:$0xff]  ;;  %v2508_v24 = vpack.c.bf16 %v317_v21, %v316_v20  ;;  %v319_v27 = vld [vmem:[#allocation16 + $0x48] sm:$0xff]  ;;  %v302_v28 = vld [vmem:[#allocation14 + $0x40] sm:$0xff]  ;;  %p3380_p10 = scmp.ne.s32.totalorder %s2164_s9, %s3379_s10  ;;  %p3385_p12 = scmp.lt.s32.totalorder %s3379_s10, %s3379_s10 }
 0x15b   :  { %v2532_v25 = vpack.c.bf16 %v301_v23, %v300_v22  ;;  %v303_v29 = vld [vmem:[#allocation14 + $0x48] sm:$0xff]  ;;  %v2511_v30 = vpack.c.bf16 %v319_v27, %v318_v26  ;;  %v320_v32 = vld [vmem:[#allocation16 + $0x50] sm:$0xff]  ;;  %v321_v33 = vld [vmem:[#allocation16 + $0x58] sm:$0xff] }
 0x15c   :  { %2503 = vmatpush3.bf16.msra.mxu0 %v2502_v12  ;;  %v2535_v31 = vpack.c.bf16 %v303_v29, %v302_v28  ;;  %v304_v34 = vld [vmem:[#allocation14 + $0x50] sm:$0xff]  ;;  %v305_v35 = vld [vmem:[#allocation14 + $0x58] sm:$0xff]  ;;  %v2514_v36 = vpack.c.bf16 %v321_v33, %v320_v32  ;;  %v322_v37 = vld [vmem:[#allocation16 + $0x60] sm:$0xff]  ;;  %p3386_p13 = por %p3385_p12, %p3384_p11 }
 0x15d   :  { %2527 = vmatpush3.bf16.msra.mxu1 %v2526_v13  ;;  %2504 = vmatprep.subr.bf16.mxu0 %v3512_v0  ;;  %v2538_v38 = vpack.c.bf16 %v305_v35, %v304_v34  ;;  %v323_v39 = vld [vmem:[#allocation16 + $0x68] sm:$0xff]  ;;  %v306_v40 = vld [vmem:[#allocation14 + $0x60] sm:$0xff]  ;;  %v324_v42 = vld [vmem:[#allocation16 + $0x70] sm:$0xff] }
 0x15e   :  { %2528 = vmatprep.subr.bf16.mxu1 %v3512_v0  ;;  %v307_v41 = vld [vmem:[#allocation14 + $0x68] sm:$0xff]  ;;  %v325_v43 = vld [vmem:[#allocation16 + $0x78] sm:$0xff]  ;;  %v2517_v44 = vpack.c.bf16 %v323_v39, %v322_v37  ;;  %v308_v45 = vld [vmem:[#allocation14 + $0x70] sm:$0xff]  ;;  %p3387_p0 = pnand %p3386_p13, %p3380_p10 }
 0x15f   :  { %v309_v46 = vld [vmem:[#allocation14 + $0x78] sm:$0xff]  ;;  %v2541_v47 = vpack.c.bf16 %v307_v41, %v306_v40  ;;  %v2520_v48 = vpack.c.bf16 %v325_v43, %v324_v42  ;;  %v475_v50 = vld [vmem:[#allocation23] sm:$0xff]  ;;  %v476_v51 = vld [vmem:[#allocation23 + $0x8] sm:$0xff] }
 0x160   :  { %2506 = vmatpush3.bf16.msra.mxu0 %v2505_v18  ;;  %v2544_v49 = vpack.c.bf16 %v309_v46, %v308_v45  ;;  %v283_v52 = vld [vmem:[#allocation8] sm:$0xf]  ;;  %v2547_v53 = vpack.c.bf16 %v476_v51, %v475_v50  ;;  %v282_v54 = vld [vmem:[#allocation5] sm:$0xf]  ;;  %v478_v56 = vld [vmem:[#allocation23 + $0x18] sm:$0xff] }
 0x161   :  { %2530 = vmatpush3.bf16.msra.mxu1 %v2529_v19  ;;  %2507 = vmatprep.subr.bf16.mxu0 %v3512_v0  ;;  %v477_v55 = vld [vmem:[#allocation23 + $0x10] sm:$0xff]  ;;  %v479_v58 = vld [vmem:[#allocation23 + $0x20] sm:$0xff]  ;;  %v480_v59 = vld [vmem:[#allocation23 + $0x28] sm:$0xff] }
 0x162   :  { %2531 = vmatprep.subr.bf16.mxu1 %v3512_v0  ;;  %v2550_v57 = vpack.c.bf16 %v478_v56, %v477_v55  ;;  %v2553_v60 = vpack.c.bf16 %v480_v59, %v479_v58  ;;  %v481_v61 = vld [vmem:[#allocation23 + $0x30] sm:$0xff]  ;;  %v482_v62 = vld [vmem:[#allocation23 + $0x38] sm:$0xff]  ;;  %v483_v2 = vld [vmem:[#allocation23 + $0x40] sm:$0xff] }
 0x163   :  { %v2556_v63 = vpack.c.bf16 %v482_v62, %v481_v61  ;;  %v484_v3 = vld [vmem:[#allocation23 + $0x48] sm:$0xff]  ;;  %v485_v5 = vld [vmem:[#allocation23 + $0x50] sm:$0xff]  ;;  %v486_v6 = vld [vmem:[#allocation23 + $0x58] sm:$0xff] }
 0x164   :  { %2509 = vmatpush3.bf16.msra.mxu0 %v2508_v24  ;;  %v2559_v4 = vpack.c.bf16 %v484_v3, %v483_v2  ;;  %v2562_v7 = vpack.c.bf16 %v486_v6, %v485_v5  ;;  %v487_v8 = vld [vmem:[#allocation23 + $0x60] sm:$0xff]  ;;  %v488_v9 = vld [vmem:[#allocation23 + $0x68] sm:$0xff]  ;;  %v489_v11 = vld [vmem:[#allocation23 + $0x70] sm:$0xff] }
 0x165   :  { %2533 = vmatpush3.bf16.msra.mxu1 %v2532_v25  ;;  %2510 = vmatprep.subr.bf16.mxu0 %v3512_v0  ;;  %v2565_v10 = vpack.c.bf16 %v488_v9, %v487_v8  ;;  %v490_v12 = vld [vmem:[#allocation23 + $0x78] sm:$0xff]  ;;  %v960_v15 = vld [vmem:[#allocation19 + $0x8] sm:$0xff]  ;;  %v3921_v16 = vld [vmem:[#allocation10] sm:$0xf] }
 0x166   :  { %2534 = vmatprep.subr.bf16.mxu1 %v3512_v0  ;;  %v2568_v13 = vpack.c.bf16 %v490_v12, %v489_v11  ;;  %v959_v14 = vld [vmem:[#allocation19] sm:$0xff]  ;;  %v961_v18 = vld [vmem:[#allocation19 + $0x10] sm:$0xff]  ;;  %v962_v19 = vld [vmem:[#allocation19 + $0x18] sm:$0xff] }
 0x167   :  { %v2595_v17 = vpack.c.bf16 %v960_v15, %v959_v14  ;;  %v2598_v20 = vpack.c.bf16 %v962_v19, %v961_v18  ;;  %v963_v21 = vld [vmem:[#allocation19 + $0x20] sm:$0xff]  ;;  %v964_v22 = vld [vmem:[#allocation19 + $0x28] sm:$0xff]  ;;  %v965_v24 = vld [vmem:[#allocation19 + $0x30] sm:$0xff] }
 0x168   :  { %2512 = vmatpush3.bf16.msra.mxu0 %v2511_v30  ;;  %v2601_v23 = vpack.c.bf16 %v964_v22, %v963_v21  ;;  %v966_v25 = vld [vmem:[#allocation19 + $0x38] sm:$0xff]  ;;  %v967_v27 = vld [vmem:[#allocation19 + $0x40] sm:$0xff]  ;;  %v968_v28 = vld [vmem:[#allocation19 + $0x48] sm:$0xff] }
 0x169   :  { %2536 = vmatpush3.bf16.msra.mxu1 %v2535_v31  ;;  %2513 = vmatprep.subr.bf16.mxu0 %v3512_v0  ;;  %v2604_v26 = vpack.c.bf16 %v966_v25, %v965_v24  ;;  %v2607_v29 = vpack.c.bf16 %v968_v28, %v967_v27  ;;  %v969_v30 = vld [vmem:[#allocation19 + $0x50] sm:$0xff]  ;;  %v970_v31 = vld [vmem:[#allocation19 + $0x58] sm:$0xff]  ;;  %v971_v33 = vld [vmem:[#allocation19 + $0x60] sm:$0xff] }
 0x16a   :  { %2537 = vmatprep.subr.bf16.mxu1 %v3512_v0  ;;  %v2610_v32 = vpack.c.bf16 %v970_v31, %v969_v30  ;;  %v972_v34 = vld [vmem:[#allocation19 + $0x68] sm:$0xff]  ;;  %v974_v37 = vld [vmem:[#allocation19 + $0x78] sm:$0xff] }
 0x16b   :  { %v2613_v35 = vpack.c.bf16 %v972_v34, %v971_v33  ;;  %v2214_v41 = vld [vmem:[#allocation17] ss:$0 sm:$0xff]  ;;  %v3944_v62 = vld [vmem:[#allocation13 + $0x10] sm:$0xff]  ;;  %v3951_v6 = vld [vmem:[#allocation13 + $0x18] sm:$0xff] }
 0x16c   :  { %2515 = vmatpush3.bf16.msra.mxu0 %v2514_v36  ;;  %v973_v36 = vld [vmem:[#allocation19 + $0x70] sm:$0xff]  ;;  %v3941_v59 = vld [vmem:[#allocation13] sm:$0xff]  ;;  %v3958_v12 = vld [vmem:[#allocation13 + $0x28] sm:$0xff] }
 0x16d   :  { %2539 = vmatpush3.bf16.msra.mxu1 %v2538_v38  ;;  %2516 = vmatprep.subr.bf16.mxu0 %v3512_v0  ;;  %v2616_v38 = vpack.c.bf16 %v974_v37, %v973_v36  ;;  %v3962_v15 = vld [vmem:[#allocation13 + $0x30] sm:$0xff]  ;;  %v3965_v18 = vld [vmem:[#allocation13 + $0x38] sm:$0xff] }
 0x16e   :  { %2540 = vmatprep.subr.bf16.mxu1 %v3512_v0 }
 0x170   :  { %2518 = vmatpush3.bf16.msra.mxu0 %v2517_v44 }
 0x171   :  { %2542 = vmatpush3.bf16.msra.mxu1 %v2541_v47  ;;  %2519 = vmatprep.subr.bf16.mxu0 %v3512_v0  ;;  %v3515_v47 = vmov 1966171168  }
 0x172   :  { %2543 = vmatprep.subr.bf16.mxu1 %v3512_v0 }
 0x174   :  { %2521 = vmatpush3.bf16.msra.mxu0 %v2520_v48  ;;  %v563_v48 = vunpack.c.l.s4 %v3515_v47 }
 0x175   :  { %2545 = vmatpush3.bf16.msra.mxu1 %v2544_v49  ;;  %2546 = vmatprep.subr.bf16.mxu0 %v3512_v0  ;;  %v565_v49 = vlaneseq }
 0x176   :  { %2570 = vmatprep.subr.bf16.mxu1 %v3512_v0  ;;  %v564_v50 = vunpack.c.0.s8 %v563_v48 }
 0x177   :  { %2356 = vmatmul.mubr.f32.vlgmr.msra.gmra.mrb[0].mxu0 %v283_v52  ;;  %v3935_v51 = vshrl.u32 %v565_v49, 7  ;;  %v639_v22 = vand.u32 127, %v565_v49 }
 0x178   :  { %2391 = vmatmul.mubr.f32.vlgmr.msra.gmra.mrb[0].mxu1 %v282_v54  ;;  %2548 = vmatpush3.bf16.msra.mxu0 %v2547_v53 }
 0x179   :  { %2549 = vmatprep.subr.bf16.mxu0 %v3512_v0  ;;  %2425 = vmatprep.mubr.msk.f32.mxu0 %vm3513_vm0, %v4453_v1  ;;  %4482 = vst [vmem:[#allocation50_spill] sm:$0xff] %v3935_v51  ;;  %v567_v52 = vsub.s32 %v564_v50, %v3935_v51  ;;  %v3939_v56 = vsub.s32 0, %v3935_v51  ;;  %v644_v24 = vadd.s32 4294967288, %v639_v22 }
 0x17a   :  { %2460 = vmatprep.mubr.msk.f32.mxu1 %vm3513_vm0, %v4453_v1 }
 0x17b   :  { %v3970_v27 = vsub.s32 %v644_v24, %v3935_v51 }
 0x17c   :  { %2551 = vmatpush3.bf16.msra.mxu0 %v2550_v57 }
 0x17d   :  { %2552 = vmatprep.subr.bf16.mxu0 %v3512_v0 }
 0x180   :  { %2554 = vmatpush3.bf16.msra.mxu0 %v2553_v60 }
 0x181   :  { %2555 = vmatprep.subr.bf16.mxu0 %v3512_v0 }
 0x184   :  { %2557 = vmatpush3.bf16.msra.mxu0 %v2556_v63 }
 0x185   :  { %2558 = vmatprep.subr.bf16.mxu0 %v3512_v0 }
 0x188   :  { %2560 = vmatpush3.bf16.msra.mxu0 %v2559_v4  ;;  %v3948_v4 = vld [vmem:[#allocation13 + $0x8] sm:$0xff] }
 0x189   :  { %2561 = vmatprep.subr.bf16.mxu0 %v3512_v0 }
 0x18c   :  { %2563 = vmatpush3.bf16.msra.mxu0 %v2562_v7 }
 0x18d   :  { %2564 = vmatprep.subr.bf16.mxu0 %v3512_v0 }
 0x190   :  { %2566 = vmatpush3.bf16.msra.mxu0 %v2565_v10  ;;  %v3955_v10 = vld [vmem:[#allocation13 + $0x20] sm:$0xff] }
 0x191   :  { %2567 = vmatprep.subr.bf16.mxu0 %v3512_v0 }
 0x194   :  { %2569 = vmatpush3.bf16.msra.mxu0 %v2568_v13 }
 0x195   :  { %2594 = vmatprep.subr.bf16.mxu0 %v3512_v0 }
 0x197   :  { %2426 = vmatmul.mubr.f32.vlgmr.msra.gmra.mrb[2].mxu0 %v3921_v16 }
 0x198   :  { %2596 = vmatpush3.bf16.msra.mxu0 %v2595_v17  ;;  %2495 = vmatprep.mubr.msk.f32.mxu0 %vm3513_vm0, %v4453_v1 }
 0x199   :  { %2597 = vmatprep.subr.bf16.mxu0 %v3512_v0 }
 0x19c   :  { %2599 = vmatpush3.bf16.msra.mxu0 %v2598_v20 }
 0x19d   :  { %2600 = vmatprep.subr.bf16.mxu0 %v3512_v0 }
 0x1a0   :  { %2602 = vmatpush3.bf16.msra.mxu0 %v2601_v23 }
 0x1a1   :  { %2603 = vmatprep.subr.bf16.mxu0 %v3512_v0 }
 0x1a4   :  { %2605 = vmatpush3.bf16.msra.mxu0 %v2604_v26 }
 0x1a5   :  { %2606 = vmatprep.subr.bf16.mxu0 %v3512_v0 }
 0x1a8   :  { %2608 = vmatpush3.bf16.msra.mxu0 %v2607_v29  ;;  %v3973_v29 = vsub.s32 %v639_v22, %v3935_v51 }
 0x1a9   :  { %2609 = vmatprep.subr.bf16.mxu0 %v3512_v0 }
 0x1ac   :  { %2611 = vmatpush3.bf16.msra.mxu0 %v2610_v32 }
 0x1ad   :  { %2612 = vmatprep.subr.bf16.mxu0 %v3512_v0 }
 0x1b0   :  { %2614 = vmatpush3.bf16.msra.mxu0 %v2613_v35 }
 0x1b1   :  { %2615 = vmatprep.subr.bf16.mxu0 %v3512_v0 }
 0x1b4   :  { %2617 = vmatpush3.bf16.msra.mxu0 %v2616_v38 }
 0x24a   :  { %v392_v39 = vpop.f32.mrb[0].mxu0 }
 0x24b   :  { %v462_v40 = vpop.f32.mrb[0].mxu1  ;;  %v2357_v42 = vpop.f32.mrb[1].mxu0 }
 0x24c   :  { %v463_v43 = vadd.f32 %v462_v40, %v392_v39  ;;  %v2392_v44 = vpop.f32.mrb[1].mxu1 }
 0x24e   :  { %v473_v45 = vadd.f32 %v2214_v41, %v463_v43 }
 0x250   :  { %v474_v46 = vmax.f32 %v473_v45, 0.0 }
 0x252   :  { %2496 = vmatmul.mubr.f32.vlgmr.msra.gmra.mrb[4].mxu0 %v474_v46 }
 0x253   :  { %1412 = vmatprep.mubr.f32.mxu0 %v4453_v1 }
 0x26a   :  { %v557_v53 = vpop.f32.mrb[2].mxu0 }
 0x26b   :  { %v568_v54 = vrot.slane %v557_v53, %v567_v52  ;;  %v2427_v55 = vpop.f32.mrb[3].mxu0  ;;  %v3996_v53 = vsub.s32 1, %v3935_v51 }
 0x26d   :  { %v569_v57 = vcombine.high %v568_v54, %v568_v54  ;;  %v576_v58 = vrot.slane %v568_v54, %v567_v52 }
 0x26f   :  { %v589_v60 = vrot.slane %v576_v58, %v3939_v56  ;;  %v583_v61 = vrot.slane %v569_v57, %v567_v52  ;;  %v584_v63 = vcombine.high %v576_v58, %v576_v58  ;;  %v4452_v52 = vmov 0  }
 0x270   :  { %2915 = vset.pattern.permute.xlu0 %v4452_v52  ;;  %2914 = vset.pattern.permute.xlu1 %v4452_v52  ;;  %v4001_v58 = vsub.s32 2, %v3935_v51 }
 0x271   :  { %v606_v2 = vmul.f32 %v589_v60, %v3941_v59  ;;  %v593_v3 = vrot.slane %v583_v61, %v3939_v56  ;;  %v607_v7 = vmul.f32 %v589_v60, %v3948_v4  ;;  %v597_v8 = vrot.slane %v584_v63, %v3939_v56 }
 0x272   :  { %v585_v9 = vcombine.high %v583_v61, %v583_v61 }
 0x273   :  { %614 = vadd.xlane.f32.xlu0 %v606_v2  ;;  %v608_v5 = vmul.f32 %v593_v3, %v3944_v62  ;;  %v609_v11 = vmul.f32 %v593_v3, %v3951_v6  ;;  %v610_v13 = vmul.f32 %v597_v8, %v3955_v10  ;;  %v611_v17 = vmul.f32 %v597_v8, %v3958_v12 }
 0x274   :  { %v601_v14 = vrot.slane %v585_v9, %v3939_v56  ;;  %v4005_v9 = vsub.s32 3, %v3935_v51 }
 0x275   :  { %618 = vadd.xlane.f32.xlu1 %v608_v5 }
 0x276   :  { %v612_v19 = vmul.f32 %v601_v14, %v3962_v15  ;;  %v613_v20 = vmul.f32 %v601_v14, %v3965_v18 }
 0x277   :  { %616 = vadd.xlane.f32.xlu0 %v607_v7 }
 0x279   :  { %620 = vadd.xlane.f32.xlu1 %v609_v11 }
 0x27b   :  { %622 = vadd.xlane.f32.xlu0 %v610_v13 }
 0x27d   :  { %624 = vadd.xlane.f32.xlu1 %v611_v17 }
 0x27f   :  { %626 = vadd.xlane.f32.xlu0 %v612_v19 }
 0x281   :  { %628 = vadd.xlane.f32.xlu1 %v613_v20 }
 0x300   :  { %v615_v21 = vpop.xlane.xlu0 %614 }
 0x301   :  { %v643_v37 = vrot.slane %v615_v21, %v3973_v29 }
 0x302   :  { %v619_v23 = vpop.xlane.xlu1 %618 }
 0x303   :  { %v654_v32 = vrot.slane %v619_v23, %v3973_v29 }
 0x304   :  { %v617_v25 = vpop.xlane.xlu0 %616 }
 0x305   :  { %v648_v33 = vrot.slane %v617_v25, %v3970_v27 }
 0x306   :  { %v621_v26 = vpop.xlane.xlu1 %620 }
 0x307   :  { %v658_v30 = vrot.slane %v621_v26, %v3970_v27  ;;  %v650_v41 = vsel %vm649_vm1, %v648_v33, %v643_v37 }
 0x308   :  { %v623_v28 = vpop.xlane.xlu0 %622 }
 0x309   :  { %v663_v35 = vrot.slane %v623_v28, %v3973_v29  ;;  %v659_v38 = vsel %vm649_vm1, %v658_v30, %v654_v32 }
 0x30a   :  { %v625_v31 = vpop.xlane.xlu1 %624  ;;  %v679_v44 = vsel %vm678_vm2, %v659_v38, %v650_v41 }
 0x30b   :  { %v667_v34 = vrot.slane %v625_v31, %v3970_v27 }
 0x30c   :  { %v627_v36 = vpop.xlane.xlu0 %626 }
 0x30d   :  { %v668_v40 = vsel %vm649_vm1, %v667_v34, %v663_v35  ;;  %v672_v42 = vrot.slane %v627_v36, %v3973_v29 }
 0x30e   :  { %v629_v39 = vpop.xlane.xlu1 %628  ;;  %v681_v46 = vsel %vm680_vm3, %v668_v40, %v679_v44 }
 0x30f   :  { %v676_v43 = vrot.slane %v629_v39, %v3970_v27 }
 0x311   :  { %v677_v45 = vsel %vm649_vm1, %v676_v43, %v672_v42 }
 0x312   :  { %v683_v47 = vsel %vm682_vm4, %v677_v45, %v681_v46 }
 0x313   :  { %v686_v48 = vsel %vm685_vm5, %v683_v47, -inf }
 0x314   :  { %687 = vmax.xlane.f32.xlu0 %v686_v48 }
 0x325   :  { %v3991_v49 = vpop.f32.mrb[4].mxu0 }
 0x326   :  { %v2497_v50 = vpop.f32.mrb[5].mxu0 }
 0x3a1   :  { %v688_v54 = vpop.xlane.xlu0 %687 }
 0x3a2   :  { %v693_v55 = vrot.slane %v688_v54, %v3939_v56  ;;  %v697_v57 = vrot.slane %v688_v54, %v3996_v53  ;;  %v701_v5 = vrot.slane %v688_v54, %v4001_v58  ;;  %v705_v14 = vrot.slane %v688_v54, %v4005_v9 }
 0x3a4   :  { %v710_v60 = vsub.f32 %v615_v21, %v693_v55  ;;  %v711_v61 = vsub.f32 %v617_v25, %v693_v55  ;;  %v712_v63 = vsub.f32 %v619_v23, %v697_v57  ;;  %v713_v7 = vsub.f32 %v621_v26, %v697_v57 }
 0x3a5   :  { %v714_v11 = vsub.f32 %v623_v28, %v701_v5  ;;  %v715_v17 = vsub.f32 %v625_v31, %v701_v5  ;;  %v716_v22 = vsub.f32 %v627_v36, %v705_v14  ;;  %v717_v25 = vsub.f32 %v629_v39, %v705_v14 }
 0x3a6   :  { %v718_v2 = vmul.f32 1.442695, %v710_v60  ;;  %v720_v3 = vmul.f32 1.442695, %v711_v61  ;;  %v722_v8 = vmul.f32 1.442695, %v712_v63 }
 0x3a7   :  { %v724_v13 = vmul.f32 1.442695, %v713_v7  ;;  %v726_v19 = vmul.f32 1.442695, %v714_v11  ;;  %v728_v23 = vmul.f32 1.442695, %v715_v17 }
 0x3a8   :  { %2940 = vpow2.f32 %v718_v2  ;;  %v730_v26 = vmul.f32 1.442695, %v716_v22  ;;  %v732_v30 = vmul.f32 1.442695, %v717_v25 }
 0x3a9   :  { %2942 = vpow2.f32 %v720_v3 }
 0x3aa   :  { %2944 = vpow2.f32 %v722_v8 }
 0x3ab   :  { %2946 = vpow2.f32 %v724_v13 }
 0x3ac   :  { %2948 = vpow2.f32 %v726_v19 }
 0x3ad   :  { %2950 = vpow2.f32 %v728_v23 }
 0x3ae   :  { %2952 = vpow2.f32 %v730_v26 }
 0x3af   :  { %2954 = vpow2.f32 %v732_v30 }
 0x3b2   :  { %v2941_v20 = vpop.eup %2940 }
 0x3b3   :  { %v2943_v21 = vpop.eup %2942  ;;  %743 = vperm.xlu1 %2914, %v2941_v20  }
 0x3b4   :  { %746 = vperm.xlu0 %2915, %v2943_v21   ;;  %v2945_v24 = vpop.eup %2944 }
 0x3b5   :  { %v2947_v28 = vpop.eup %2946 }
 0x3b6   :  { %v2949_v32 = vpop.eup %2948 }
 0x3b7   :  { %749 = vperm.xlu1 %2914, %v2945_v24   ;;  %v2951_v31 = vpop.eup %2950 }
 0x3b8   :  { %v2953_v33 = vpop.eup %2952 }
 0x3b9   :  { %v4008_v34 = vpop.eup %2954 }
 0x3bb   :  { %752 = vperm.xlu1 %2914, %v2947_v28  }
 0x3bf   :  { %755 = vperm.xlu1 %2914, %v2949_v32  }
 0x3c3   :  { %758 = vperm.xlu1 %2914, %v2951_v31  }
 0x3c7   :  { %761 = vperm.xlu1 %2914, %v2953_v33  }
 0x3cb   :  { %764 = vperm.xlu1 %2914, %v4008_v34  }
 0x432   :  { %v744_v35 = vpop.permute.xlu1 %743 }
 0x433   :  { %v747_v40 = vpop.permute.xlu0 %746  ;;  %v769_v45 = vrot.slane %v744_v35, %v3973_v29 }
 0x434   :  { %v773_v44 = vrot.slane %v747_v40, %v3970_v27  ;;  %v977_v40 = vld [vmem:[#allocation20 + $0x10] sm:$0xff] }
 0x436   :  { %v750_v36 = vpop.permute.xlu1 %749  ;;  %v774_v55 = vsel %vm649_vm1, %v773_v44, %v769_v45  ;;  %v983_v45 = vld [vmem:[#allocation20 + $0x40] sm:$0xff] }
 0x437   :  { %v778_v46 = vrot.slane %v750_v36, %v3973_v29 }
 0x43a   :  { %v753_v37 = vpop.permute.xlu1 %752 }
 0x43b   :  { %v782_v41 = vrot.slane %v753_v37, %v3970_v27  ;;  %v975_v37 = vld [vmem:[#allocation20] sm:$0xff] }
 0x43d   :  { %v783_v48 = vsel %vm649_vm1, %v782_v41, %v778_v46  ;;  %v978_v41 = vld [vmem:[#allocation20 + $0x18] sm:$0xff]  ;;  %v984_v46 = vld [vmem:[#allocation20 + $0x48] sm:$0xff] }
 0x43e   :  { %v756_v38 = vpop.permute.xlu1 %755  ;;  %v802_v61 = vsel %vm678_vm2, %v783_v48, %v774_v55  ;;  %v986_v48 = vld [vmem:[#allocation20 + $0x58] sm:$0xff]  ;;  %v988_v55 = vld [vmem:[#allocation20 + $0x68] sm:$0xff] }
 0x43f   :  { %v787_v47 = vrot.slane %v756_v38, %v3973_v29  ;;  %v976_v38 = vld [vmem:[#allocation20 + $0x8] sm:$0xff] }
 0x442   :  { %v759_v39 = vpop.permute.xlu1 %758 }
 0x443   :  { %v791_v42 = vrot.slane %v759_v39, %v3970_v27 }
 0x445   :  { %v792_v50 = vsel %vm649_vm1, %v791_v42, %v787_v47  ;;  %v2583_v47 = vpack.c.bf16 %v984_v46, %v983_v45  ;;  %v1254_v45 = vld [vmem:[#allocation26 + $0x158] sm:$0xff] }
 0x446   :  { %v762_v43 = vpop.permute.xlu1 %761  ;;  %v803_v2 = vsel %vm680_vm3, %v792_v50, %v802_v61  ;;  %v990_v61 = vld [vmem:[#allocation20 + $0x78] sm:$0xff] }
 0x447   :  { %v796_v57 = vrot.slane %v762_v43, %v3973_v29  ;;  %v981_v43 = vld [vmem:[#allocation20 + $0x30] sm:$0xff]  ;;  %v1258_v46 = vld [vmem:[#allocation26 + $0x178] sm:$0xff] }
 0x44a   :  { %v765_v54 = vpop.permute.xlu1 %764 }
 0x44b   :  { %v800_v60 = vrot.slane %v765_v54, %v3970_v27  ;;  %v987_v54 = vld [vmem:[#allocation20 + $0x60] sm:$0xff] }
 0x44d   :  { %v801_v63 = vsel %vm649_vm1, %v800_v60, %v796_v57  ;;  %v2589_v57 = vpack.c.bf16 %v988_v55, %v987_v54  ;;  %v989_v60 = vld [vmem:[#allocation20 + $0x70] sm:$0xff]  ;;  %v1262_v54 = vld [vmem:[#allocation26 + $0x198] sm:$0xff] }
 0x44e   :  { %v804_v3 = vsel %vm682_vm4, %v801_v63, %v803_v2  ;;  %v2592_v63 = vpack.c.bf16 %v990_v61, %v989_v60  ;;  %v1212_v2 = vld [vmem:[#allocation26 + $0x8] sm:$0xff]  ;;  %v1266_v55 = vld [vmem:[#allocation26 + $0x1b8] sm:$0xff]  ;;  %v1261_v60 = vld [vmem:[#allocation26 + $0x190] sm:$0xff] }
 0x44f   :  { %v806_v5 = vsel %vm685_vm5, %v804_v3, 0.0  ;;  %v1216_v3 = vld [vmem:[#allocation26 + $0x28] sm:$0xff]  ;;  %v1265_v61 = vld [vmem:[#allocation26 + $0x1b0] sm:$0xff] }
 0x450   :  { %807 = vadd.xlane.f32.xlu1 %v806_v5  ;;  %v1214_v5 = vld [vmem:[#allocation26 + $0x18] sm:$0xff] }
 0x4dd   :  { %v808_v7 = vpop.xlane.xlu1 %807 }
 0x4de   :  { %v813_v8 = vrot.slane %v808_v7, %v3939_v56  ;;  %v817_v11 = vrot.slane %v808_v7, %v3996_v53  ;;  %v821_v14 = vrot.slane %v808_v7, %v4001_v58  ;;  %v825_v23 = vrot.slane %v808_v7, %v4005_v9 }
 0x4df   :  { %v4039_v7 = vpack.c.bf16 %v1216_v3, %v1212_v2  ;;  %v1270_v2 = vld [vmem:[#allocation26 + $0x1d8] sm:$0xff] }
 0x4e0   :  { %2956 = vrcp.f32 %v813_v8  ;;  %v1218_v8 = vld [vmem:[#allocation26 + $0x38] sm:$0xff] }
 0x4e1   :  { %2958 = vrcp.f32 %v817_v11  ;;  %v4041_v11 = vpack.c.bf16 %v1218_v8, %v1214_v5  ;;  %v1274_v3 = vld [vmem:[#allocation26 + $0x1f8] sm:$0xff]  ;;  %v1269_v8 = vld [vmem:[#allocation26 + $0x1d0] sm:$0xff] }
 0x4e2   :  { %2960 = vrcp.f32 %v821_v14  ;;  %v1217_v14 = vld [vmem:[#allocation26 + $0x30] sm:$0xff]  ;;  %v4083_v5 = vpack.c.bf16 %v1274_v3, %v1270_v2  ;;  %v1186_v2 = vld [vmem:[#allocation25 + $0x138] sm:$0xff] }
 0x4e3   :  { %2962 = vrcp.f32 %v825_v23  ;;  %2651 = vmatprep.subr.bf16.mxu0 %v4041_v11 }
 0x4ea   :  { %v2957_v13 = vpop.eup %2956 }
 0x4eb   :  { %v831_v17 = vmul.f32 %v2957_v13, %v2941_v20  ;;  %v832_v19 = vmul.f32 %v2957_v13, %v2943_v21  ;;  %v2959_v22 = vpop.eup %2958  ;;  %v2571_v20 = vpack.c.bf16 %v976_v38, %v975_v37  ;;  %v1213_v13 = vld [vmem:[#allocation26 + $0x10] sm:$0xff] }
 0x4ec   :  { %v834_v25 = vmul.f32 %v2959_v22, %v2945_v24  ;;  %v835_v26 = vmul.f32 %v2959_v22, %v2947_v28  ;;  %v2961_v30 = vpop.eup %2960  ;;  %v2574_v24 = vpack.c.bf16 %v978_v41, %v977_v40  ;;  %v1226_v22 = vld [vmem:[#allocation26 + $0x78] sm:$0xff]  ;;  %v1229_v37 = vld [vmem:[#allocation26 + $0x90] sm:$0xff] }
 0x4ed   :  { %844 = vperm.xlu0 %2915, %v831_v17   ;;  %v837_v35 = vmul.f32 %v2961_v30, %v2949_v32  ;;  %v838_v36 = vmul.f32 %v2961_v30, %v2951_v31  ;;  %v2963_v39 = vpop.eup %2962  ;;  %2572 = vmatpush3.bf16.msra.mxu1 %v2571_v20  ;;  %v979_v32 = vld [vmem:[#allocation20 + $0x20] sm:$0xff]  ;;  %v980_v31 = vld [vmem:[#allocation20 + $0x28] sm:$0xff]  ;;  %v4043_v17 = vpack.c.bf16 %v1217_v14, %v1213_v13  ;;  %v1233_v38 = vld [vmem:[#allocation26 + $0xb0] sm:$0xff] }
 0x4ee   :  { %v840_v21 = vmul.f32 %v2963_v39, %v2953_v33  ;;  %2573 = vmatprep.subr.bf16.mxu1 %v3512_v0  ;;  %v841_v28 = vmul.f32 %v2963_v39, %v4008_v34  ;;  %v2577_v42 = vpack.c.bf16 %v980_v31, %v979_v32  ;;  %v982_v33 = vld [vmem:[#allocation20 + $0x38] sm:$0xff]  ;;  %v985_v34 = vld [vmem:[#allocation20 + $0x50] sm:$0xff]  ;;  %v4057_v39 = vpack.c.bf16 %v1233_v38, %v1229_v37 }
 0x4ef   :  { %v2580_v44 = vpack.c.bf16 %v982_v33, %v981_v43  ;;  %v2586_v50 = vpack.c.bf16 %v986_v48, %v985_v34  ;;  %2653 = vmatpush1.bf16.msra.mxu0 %v4043_v17  ;;  %v1230_v30 = vld [vmem:[#allocation26 + $0x98] sm:$0xff]  ;;  %v1237_v41 = vld [vmem:[#allocation26 + $0xd0] sm:$0xff] }
 0x4f0   :  { %v1238_v20 = vld [vmem:[#allocation26 + $0xd8] sm:$0xff]  ;;  %v1245_v43 = vld [vmem:[#allocation26 + $0x110] sm:$0xff] }
 0x4f1   :  { %849 = vperm.xlu0 %2915, %v832_v19   ;;  %2575 = vmatpush3.bf16.msra.mxu1 %v2574_v24  ;;  %v1222_v19 = vld [vmem:[#allocation26 + $0x58] sm:$0xff]  ;;  %v1241_v24 = vld [vmem:[#allocation26 + $0xf0] sm:$0xff] }
 0x4f2   :  { %2576 = vmatprep.subr.bf16.mxu1 %v3512_v0  ;;  %v4046_v23 = vpack.c.bf16 %v1226_v22, %v1222_v19  ;;  %v1246_v32 = vld [vmem:[#allocation26 + $0x118] sm:$0xff]  ;;  %v1249_v33 = vld [vmem:[#allocation26 + $0x130] sm:$0xff] }
 0x4f3   :  { %v1250_v31 = vld [vmem:[#allocation26 + $0x138] sm:$0xff]  ;;  %v1253_v34 = vld [vmem:[#allocation26 + $0x150] sm:$0xff] }
 0x4f4   :  { %2655 = vmatprep.subr.bf16.mxu0 %v4046_v23  ;;  %v1257_v48 = vld [vmem:[#allocation26 + $0x170] sm:$0xff]  ;;  %v1150_v19 = vld [vmem:[#allocation25 + $0x18] sm:$0xff] }
 0x4f5   :  { %854 = vperm.xlu0 %2915, %v834_v25   ;;  %2578 = vmatpush3.bf16.msra.mxu1 %v2577_v42  ;;  %v1225_v25 = vld [vmem:[#allocation26 + $0x70] sm:$0xff]  ;;  %v4065_v42 = vpack.c.bf16 %v1250_v31, %v1246_v32  ;;  %v1154_v22 = vld [vmem:[#allocation25 + $0x38] sm:$0xff] }
 0x4f6   :  { %2579 = vmatprep.subr.bf16.mxu1 %v3512_v0  ;;  %v1273_v13 = vld [vmem:[#allocation26 + $0x1f0] sm:$0xff]  ;;  %v1158_v37 = vld [vmem:[#allocation25 + $0x58] sm:$0xff] }
 0x4f7   :  { %v4087_v14 = vpack.c.bf16 %v1273_v13, %v1269_v8  ;;  %v1162_v38 = vld [vmem:[#allocation25 + $0x78] sm:$0xff]  ;;  %v1181_v8 = vld [vmem:[#allocation25 + $0x110] sm:$0xff] }
 0x4f8   :  { %v1166_v32 = vld [vmem:[#allocation25 + $0x98] sm:$0xff]  ;;  %v1185_v13 = vld [vmem:[#allocation25 + $0x130] sm:$0xff] }
 0x4f9   :  { %859 = vperm.xlu0 %2915, %v835_v26   ;;  %2581 = vmatpush3.bf16.msra.mxu1 %v2580_v44  ;;  %v4069_v44 = vpack.c.bf16 %v1249_v33, %v1245_v43  ;;  %v1170_v31 = vld [vmem:[#allocation25 + $0xb8] sm:$0xff]  ;;  %v1165_v33 = vld [vmem:[#allocation25 + $0x90] sm:$0xff] }
 0x4fa   :  { %2582 = vmatprep.subr.bf16.mxu1 %v3512_v0  ;;  %v4103_v43 = vpack.c.bf16 %v1170_v31, %v1166_v32  ;;  %v1202_v32 = vld [vmem:[#allocation25 + $0x1b8] sm:$0xff] }
 0x4fd   :  { %864 = vperm.xlu0 %2915, %v837_v35   ;;  %2584 = vmatpush3.bf16.msra.mxu1 %v2583_v47  ;;  %v1234_v35 = vld [vmem:[#allocation26 + $0xb8] sm:$0xff]  ;;  %v4071_v47 = vpack.c.bf16 %v1258_v46, %v1254_v45  ;;  %v1169_v45 = vld [vmem:[#allocation25 + $0xb0] sm:$0xff] }
 0x4fe   :  { %2585 = vmatprep.subr.bf16.mxu1 %v3512_v0  ;;  %v1174_v46 = vld [vmem:[#allocation25 + $0xd8] sm:$0xff] }
 0x501   :  { %869 = vperm.xlu0 %2915, %v838_v36   ;;  %2587 = vmatpush3.bf16.msra.mxu1 %v2586_v50  ;;  %v4053_v36 = vpack.c.bf16 %v1234_v35, %v1230_v30  ;;  %v4075_v50 = vpack.c.bf16 %v1257_v48, %v1253_v34  ;;  %v1153_v30 = vld [vmem:[#allocation25 + $0x30] sm:$0xff]  ;;  %v1178_v34 = vld [vmem:[#allocation25 + $0xf8] sm:$0xff] }
 0x502   :  { %2588 = vmatprep.subr.bf16.mxu1 %v3512_v0  ;;  %v4109_v48 = vpack.c.bf16 %v1178_v34, %v1174_v46 }
 0x504   :  { %4484 = vst [vmem:[#allocation52_spill] sm:$0xff] %v4109_v48 }
 0x505   :  { %874 = vperm.xlu0 %2915, %v840_v21   ;;  %2590 = vmatpush3.bf16.msra.mxu1 %v2589_v57  ;;  %v1242_v21 = vld [vmem:[#allocation26 + $0xf8] sm:$0xff]  ;;  %v4077_v57 = vpack.c.bf16 %v1266_v55, %v1262_v54  ;;  %v1173_v54 = vld [vmem:[#allocation25 + $0xd0] sm:$0xff] }
 0x506   :  { %2591 = vmatprep.subr.bf16.mxu1 %v3512_v0  ;;  %v1221_v0 = vld [vmem:[#allocation26 + $0x50] sm:$0xff]  ;;  %v4059_v40 = vpack.c.bf16 %v1242_v21, %v1238_v20  ;;  %v4095_v20 = vpack.c.bf16 %v1162_v38, %v1158_v37 }
 0x507   :  { %v4051_v26 = vpack.c.bf16 %v1225_v25, %v1221_v0  ;;  %v4089_v0 = vpack.c.bf16 %v1154_v22, %v1150_v19  ;;  %v1149_v25 = vld [vmem:[#allocation25 + $0x10] sm:$0xff]  ;;  %v4119_v19 = vpack.c.bf16 %v1185_v13, %v1181_v8  ;;  %v1190_v22 = vld [vmem:[#allocation25 + $0x158] sm:$0xff] }
 0x508   :  { %v4093_v35 = vpack.c.bf16 %v1153_v30, %v1149_v25  ;;  %v1157_v21 = vld [vmem:[#allocation25 + $0x50] sm:$0xff]  ;;  %v1194_v25 = vld [vmem:[#allocation25 + $0x178] sm:$0xff] }
 0x509   :  { %879 = vperm.xlu0 %2915, %v841_v28   ;;  %2593 = vmatpush3.bf16.msra.mxu1 %v2592_v63  ;;  %v4063_v28 = vpack.c.bf16 %v1241_v24, %v1237_v41  ;;  %v4081_v63 = vpack.c.bf16 %v1265_v61, %v1261_v60  ;;  %v1161_v41 = vld [vmem:[#allocation25 + $0x70] sm:$0xff]  ;;  %v1182_v61 = vld [vmem:[#allocation25 + $0x118] sm:$0xff]  ;;  %4487 = vst [vmem:[#allocation55_spill] sm:$0xff] %v4119_v19 }
 0x50a   :  { %2619 = vmatprep.subr.bf16.mxu1 %v4039_v7  ;;  %2657 = vmatpush1.bf16.msra.mxu0 %v4051_v26  ;;  %v4101_v24 = vpack.c.bf16 %v1161_v41, %v1157_v21  ;;  %v1177_v55 = vld [vmem:[#allocation25 + $0xf0] sm:$0xff]  ;;  %v4115_v3 = vpack.c.bf16 %v1186_v2, %v1182_v61  ;;  %v4121_v30 = vpack.c.bf16 %v1194_v25, %v1190_v22  ;;  %v1198_v41 = vld [vmem:[#allocation25 + $0x198] sm:$0xff] }
 0x50b   :  { %2659 = vmatprep.subr.bf16.mxu0 %v4053_v36  ;;  %v4113_v60 = vpack.c.bf16 %v1177_v55, %v1173_v54  ;;  %v1189_v37 = vld [vmem:[#allocation25 + $0x150] sm:$0xff]  ;;  %v4127_v31 = vpack.c.bf16 %v1202_v32, %v1198_v41 }
 0x50c   :  { %4486 = vst [vmem:[#allocation54_spill] sm:$0xff] %v4115_v3  ;;  %4488 = vst [vmem:[#allocation56_spill] sm:$0xff] %v4121_v30  ;;  %v1193_v38 = vld [vmem:[#allocation25 + $0x170] sm:$0xff] }
 0x50d   :  { %4485 = vst [vmem:[#allocation53_spill] sm:$0xff] %v4113_v60  ;;  %v4125_v21 = vpack.c.bf16 %v1193_v38, %v1189_v37  ;;  %4490 = vst [vmem:[#allocation58_spill] sm:$0xff] %v4127_v31 }
 0x50e   :  { %2661 = vmatpush1.bf16.msra.mxu0 %v4057_v39 }
 0x50f   :  { %2663 = vmatprep.subr.bf16.mxu0 %v4059_v40  ;;  %4489 = vst [vmem:[#allocation57_spill] sm:$0xff] %v4125_v21 }
 0x512   :  { %2665 = vmatpush1.bf16.msra.mxu0 %v4063_v28 }
 0x513   :  { %2667 = vmatprep.subr.bf16.mxu0 %v4065_v42 }
 0x516   :  { %2669 = vmatpush1.bf16.msra.mxu0 %v4069_v44 }
 0x517   :  { %2671 = vmatprep.subr.bf16.mxu0 %v4071_v47 }
 0x51a   :  { %2673 = vmatpush1.bf16.msra.mxu0 %v4075_v50 }
 0x51b   :  { %2675 = vmatprep.subr.bf16.mxu0 %v4077_v57 }
 0x51e   :  { %2677 = vmatpush1.bf16.msra.mxu0 %v4081_v63 }
 0x51f   :  { %2679 = vmatprep.subr.bf16.mxu0 %v4083_v5 }
 0x522   :  { %2681 = vmatpush1.bf16.msra.mxu0 %v4087_v14 }
 0x523   :  { %2715 = vmatprep.subr.bf16.mxu0 %v4089_v0 }
 0x525   :  { %1413 = vmatmul.mubr.f32.vlgmr.msra.gmra.mrb[6].mxu0 %v3921_v16  ;;  %v4107_v16 = vpack.c.bf16 %v1169_v45, %v1165_v33 }
 0x526   :  { %2717 = vmatpush1.bf16.msra.mxu0 %v4093_v35  ;;  %1554 = vmatprep.mubr.f32.mxu0 %v4453_v1 }
 0x527   :  { %2719 = vmatprep.subr.bf16.mxu0 %v4095_v20  ;;  %4483 = vst [vmem:[#allocation51_spill] sm:$0xff] %v4107_v16 }
 0x52a   :  { %2721 = vmatpush1.bf16.msra.mxu0 %v4101_v24 }
 0x52b   :  { %2723 = vmatprep.subr.bf16.mxu0 %v4103_v43 }
 0x52e   :  { %2725 = vmatpush1.bf16.msra.mxu0 %v4107_v16  ;;  %v1191_v16 = vld [vmem:[#allocation25 + $0x160] sm:$0xff] }
 0x52f   :  { %2727 = vmatprep.subr.bf16.mxu0 %v4109_v48  ;;  %v1187_v48 = vld [vmem:[#allocation25 + $0x140] sm:$0xff] }
 0x532   :  { %2729 = vmatpush1.bf16.msra.mxu0 %v4113_v60  ;;  %v1183_v60 = vld [vmem:[#allocation25 + $0x120] sm:$0xff] }
 0x533   :  { %2731 = vmatprep.subr.bf16.mxu0 %v4115_v3  ;;  %v1179_v3 = vld [vmem:[#allocation25 + $0x100] sm:$0xff] }
 0x536   :  { %2733 = vmatpush1.bf16.msra.mxu0 %v4119_v19  ;;  %v1184_v19 = vld [vmem:[#allocation25 + $0x128] sm:$0xff] }
 0x537   :  { %2735 = vmatprep.subr.bf16.mxu0 %v4121_v30  ;;  %v1180_v30 = vld [vmem:[#allocation25 + $0x108] sm:$0xff] }
 0x53a   :  { %2737 = vmatpush1.bf16.msra.mxu0 %v4125_v21 }
 0x53b   :  { %2739 = vmatprep.subr.bf16.mxu0 %v4127_v31  ;;  %v3004_v31 = vld [vmem:[#allocation10] sm:$0xf] }
 0x56c   :  { %v845_v33 = vpop.permute.xlu0 %844 }
 0x56d   :  { %v882_v2 = vmul.f32 %v845_v33, %v3941_v59 }
 0x570   :  { %v850_v45 = vpop.permute.xlu0 %849 }
 0x571   :  { %v883_v34 = vmul.f32 %v850_v45, %v3948_v4 }
 0x573   :  { %v890_v13 = vadd.f32 %v883_v34, %v882_v2 }
 0x574   :  { %v855_v46 = vpop.permute.xlu0 %854 }
 0x575   :  { %v884_v55 = vmul.f32 %v855_v46, %v3944_v62  ;;  %v891_v37 = vrot.slane %v890_v13, 4  ;;  %v925_v62 = vrot.slane %v850_v45, %v3970_v27  ;;  %v930_v34 = vrot.slane %v855_v46, %v3973_v29 }
 0x577   :  { %v892_v51 = vadd.f32 %v891_v37, %v890_v13 }
 0x578   :  { %v860_v54 = vpop.permute.xlu0 %859 }
 0x579   :  { %v885_v61 = vmul.f32 %v860_v54, %v3951_v6  ;;  %v934_v4 = vrot.slane %v860_v54, %v3970_v27 }
 0x57b   :  { %v897_v8 = vadd.f32 %v885_v61, %v884_v55  ;;  %v921_v61 = vrot.slane %v845_v33, %v3973_v29 }
 0x57c   :  { %v865_v22 = vpop.permute.xlu0 %864 }
 0x57d   :  { %v898_v25 = vrot.slane %v897_v8, 4  ;;  %v886_v41 = vmul.f32 %v865_v22, %v3955_v10  ;;  %v939_v2 = vrot.slane %v865_v22, %v3973_v29  ;;  %v926_v54 = vsel %vm649_vm1, %v925_v62, %v921_v61 }
 0x57f   :  { %v899_v52 = vadd.f32 %v898_v25, %v897_v8  ;;  %v893_v25 = vrot.slane %v892_v51, 2 }
 0x580   :  { %v870_v38 = vpop.permute.xlu0 %869 }
 0x581   :  { %v887_v32 = vmul.f32 %v870_v38, %v3958_v12  ;;  %v943_v6 = vrot.slane %v870_v38, %v3970_v27  ;;  %v900_v10 = vrot.slane %v899_v52, 2  ;;  %v935_v12 = vsel %vm649_vm1, %v934_v4, %v930_v34 }
 0x582   :  { %v954_v22 = vsel %vm678_vm2, %v935_v12, %v926_v54  ;;  %v1215_v54 = vld [vmem:[#allocation26 + $0x20] sm:$0xff] }
 0x583   :  { %v904_v1 = vadd.f32 %v887_v32, %v886_v41  ;;  %v944_v13 = vsel %vm649_vm1, %v943_v6, %v939_v2  ;;  %v901_v32 = vadd.f32 %v900_v10, %v899_v52  ;;  %v1211_v10 = vld [vmem:[#allocation26] sm:$0xff] }
 0x584   :  { %v875_v59 = vpop.permute.xlu0 %874  ;;  %v955_v62 = vsel %vm680_vm3, %v944_v13, %v954_v22  ;;  %v1220_v13 = vld [vmem:[#allocation26 + $0x48] sm:$0xff]  ;;  %v1223_v22 = vld [vmem:[#allocation26 + $0x60] sm:$0xff] }
 0x585   :  { %v905_v55 = vrot.slane %v904_v1, 4  ;;  %v888_v45 = vmul.f32 %v875_v59, %v3962_v15  ;;  %v948_v46 = vrot.slane %v875_v59, %v3973_v29  ;;  %v894_v15 = vadd.f32 %v893_v25, %v892_v51 }
 0x586   :  { %v902_v29 = vrot.slane %v901_v32, 1  ;;  %v4156_v25 = vpack.c.bf16 %v1215_v54, %v1211_v10 }
 0x587   :  { %v906_v8 = vadd.f32 %v905_v55, %v904_v1  ;;  %v895_v61 = vrot.slane %v894_v15, 1 }
 0x588   :  { %v880_v37 = vpop.permute.xlu0 %879  ;;  %v903_v2 = vadd.f32 %v902_v29, %v901_v32  ;;  %v1236_v29 = vld [vmem:[#allocation26 + $0xc8] sm:$0xff] }
 0x589   :  { %v907_v38 = vrot.slane %v906_v8, 2  ;;  %v889_v41 = vmul.f32 %v880_v37, %v3965_v18  ;;  %v952_v33 = vrot.slane %v880_v37, %v3970_v27 }
 0x58b   :  { %v911_v4 = vadd.f32 %v889_v41, %v888_v45  ;;  %v953_v1 = vsel %vm649_vm1, %v952_v33, %v948_v46  ;;  %v908_v34 = vadd.f32 %v907_v38, %v906_v8  ;;  %v896_v45 = vadd.f32 %v895_v61, %v894_v15  ;;  %v1224_v8 = vld [vmem:[#allocation26 + $0x68] sm:$0xff]  ;;  %v1219_v33 = vld [vmem:[#allocation26 + $0x40] sm:$0xff] }
 0x58c   :  { %v956_v6 = vsel %vm682_vm4, %v953_v1, %v955_v62  ;;  %v4159_v41 = vpack.c.bf16 %v1224_v8, %v1220_v13  ;;  %v1232_v1 = vld [vmem:[#allocation26 + $0xa8] sm:$0xff]  ;;  %v4163_v62 = vpack.c.bf16 %v1223_v22, %v1219_v33  ;;  %v1227_v15 = vld [vmem:[#allocation26 + $0x80] sm:$0xff] }
 0x58d   :  { %v912_v55 = vrot.slane %v911_v4, 4  ;;  %958 = vst.msk [vmem:[#allocation36] sm:$0xf] %vm685_vm5, %v956_v6  ;;  %v909_v18 = vrot.slane %v908_v34, 1  ;;  %v995_v51 = vsel %vm678_vm2, %v903_v2, %v896_v45  ;;  %v1239_v2 = vld [vmem:[#allocation26 + $0xe0] sm:$0xff]  ;;  %v1252_v13 = vld [vmem:[#allocation26 + $0x148] sm:$0xff] }
 0x58e   :  { %v1243_v45 = vld [vmem:[#allocation26 + $0x100] sm:$0xff]  ;;  %v1256_v8 = vld [vmem:[#allocation26 + $0x168] sm:$0xff] }
 0x58f   :  { %v913_v59 = vadd.f32 %v912_v55, %v911_v4  ;;  %v910_v52 = vadd.f32 %v909_v18, %v908_v34  ;;  %v1228_v4 = vld [vmem:[#allocation26 + $0x88] sm:$0xff]  ;;  %v4491_v34 = vmov 0.0   ;;  %v1231_v55 = vld [vmem:[#allocation26 + $0xa0] sm:$0xff] }
 0x590   :  { %v4167_v6 = vpack.c.bf16 %v1232_v1, %v1228_v4  ;;  %v4170_v18 = vpack.c.bf16 %v1231_v55, %v1227_v15  ;;  %v1255_v33 = vld [vmem:[#allocation26 + $0x160] sm:$0xff]  ;;  %v1260_v22 = vld [vmem:[#allocation26 + $0x188] sm:$0xff]  ;;  %1929 = vst.msk [vmem:[#allocation4] sm:$0xf] %vm1927_vm6, %v4491_v34 }
 0x591   :  { %v914_v27 = vrot.slane %v913_v59, 2  ;;  %v996_v46 = vsel %vm680_vm3, %v910_v52, %v995_v51  ;;  %v1248_v52 = vld [vmem:[#allocation26 + $0x128] sm:$0xff]  ;;  %v4185_v51 = vpack.c.bf16 %v1256_v8, %v1252_v13  ;;  %v1259_v15 = vld [vmem:[#allocation26 + $0x180] sm:$0xff] }
 0x592   :  { %v1263_v55 = vld [vmem:[#allocation26 + $0x1a0] sm:$0xff] }
 0x593   :  { %v915_v12 = vadd.f32 %v914_v27, %v913_v59  ;;  %v1240_v59 = vld [vmem:[#allocation26 + $0xe8] sm:$0xff]  ;;  %v1235_v27 = vld [vmem:[#allocation26 + $0xc0] sm:$0xff] }
 0x594   :  { %v4173_v61 = vpack.c.bf16 %v1240_v59, %v1236_v29  ;;  %v4176_v10 = vpack.c.bf16 %v1239_v2, %v1235_v27  ;;  %v1268_v29 = vld [vmem:[#allocation26 + $0x1c8] sm:$0xff]  ;;  %v4194_v27 = vpack.c.bf16 %v1263_v55, %v1259_v15 }
 0x595   :  { %v916_v37 = vrot.slane %v915_v12, 1  ;;  %v1272_v59 = vld [vmem:[#allocation26 + $0x1e8] sm:$0xff] }
 0x596   :  { %v4197_v2 = vpack.c.bf16 %v1272_v59, %v1268_v29  ;;  %v1155_v29 = vld [vmem:[#allocation25 + $0x40] sm:$0xff] }
 0x597   :  { %v917_v38 = vadd.f32 %v916_v37, %v915_v12  ;;  %v1244_v12 = vld [vmem:[#allocation26 + $0x108] sm:$0xff]  ;;  %v1247_v37 = vld [vmem:[#allocation26 + $0x120] sm:$0xff] }
 0x598   :  { %v4179_v54 = vpack.c.bf16 %v1248_v52, %v1244_v12  ;;  %v1267_v12 = vld [vmem:[#allocation26 + $0x1c0] sm:$0xff] }
 0x599   :  { %v997_v32 = vsel %vm682_vm4, %v917_v38, %v996_v46  ;;  %v4182_v38 = vpack.c.bf16 %v1247_v37, %v1243_v45  ;;  %v1251_v46 = vld [vmem:[#allocation26 + $0x140] sm:$0xff]  ;;  %v1148_v45 = vld [vmem:[#allocation25 + $0x8] sm:$0xff] }
 0x59a   :  { %2461 = vmatmul.mubr.f32.vlgmr.msra.gmra.mrb[2].mxu1 %v997_v32  ;;  %v1264_v32 = vld [vmem:[#allocation26 + $0x1a8] sm:$0xff]  ;;  %v4188_v4 = vpack.c.bf16 %v1255_v33, %v1251_v46  ;;  %v1271_v52 = vld [vmem:[#allocation26 + $0x1e0] sm:$0xff] }
 0x59b   :  { %2621 = vmatpush1.bf16.msra.mxu1 %v4156_v25  ;;  %1341 = vmatprep.mubr.f32.mxu1 %v4491_v34  ;;  %v4191_v1 = vpack.c.bf16 %v1264_v32, %v1260_v22  ;;  %v1152_v37 = vld [vmem:[#allocation25 + $0x28] sm:$0xff]  ;;  %v4200_v13 = vpack.c.bf16 %v1271_v52, %v1267_v12  ;;  %v1147_v46 = vld [vmem:[#allocation25] sm:$0xff] }
 0x59c   :  { %2623 = vmatprep.subr.bf16.mxu1 %v4159_v41  ;;  %v4203_v8 = vpack.c.bf16 %v1152_v37, %v1148_v45  ;;  %v1151_v33 = vld [vmem:[#allocation25 + $0x20] sm:$0xff]  ;;  %v1156_v22 = vld [vmem:[#allocation25 + $0x48] sm:$0xff] }
 0x59d   :  { %v1160_v32 = vld [vmem:[#allocation25 + $0x68] sm:$0xff]  ;;  %v4206_v15 = vpack.c.bf16 %v1151_v33, %v1147_v46  ;;  %v1159_v59 = vld [vmem:[#allocation25 + $0x60] sm:$0xff] }
 0x59e   :  { %v4209_v55 = vpack.c.bf16 %v1160_v32, %v1156_v22  ;;  %v1164_v12 = vld [vmem:[#allocation25 + $0x88] sm:$0xff]  ;;  %v4212_v45 = vpack.c.bf16 %v1159_v59, %v1155_v29  ;;  %v1163_v46 = vld [vmem:[#allocation25 + $0x80] sm:$0xff] }
 0x59f   :  { %2625 = vmatpush1.bf16.msra.mxu1 %v4163_v62  ;;  %v1168_v52 = vld [vmem:[#allocation25 + $0xa8] sm:$0xff]  ;;  %v1167_v33 = vld [vmem:[#allocation25 + $0xa0] sm:$0xff] }
 0x5a0   :  { %2627 = vmatprep.subr.bf16.mxu1 %v4167_v6  ;;  %v4216_v37 = vpack.c.bf16 %v1168_v52, %v1164_v12  ;;  %v1172_v22 = vld [vmem:[#allocation25 + $0xc8] sm:$0xff]  ;;  %v4219_v21 = vpack.c.bf16 %v1167_v33, %v1163_v46  ;;  %v1171_v29 = vld [vmem:[#allocation25 + $0xc0] sm:$0xff]  ;;  %v4228_v52 = vpack.c.bf16 %v1184_v19, %v1180_v30  ;;  %v4237_v19 = vpack.c.bf16 %v1191_v16, %v1187_v48  ;;  %v1206_v48 = vld [vmem:[#allocation25 + $0x1d8] sm:$0xff] }
 0x5a1   :  { %v1176_v32 = vld [vmem:[#allocation25 + $0xe8] sm:$0xff]  ;;  %v1175_v59 = vld [vmem:[#allocation25 + $0xe0] sm:$0xff] }
 0x5a2   :  { %4492 = vst [vmem:[#allocation59_spill] sm:$0xff] %v4219_v21  ;;  %v4225_v12 = vpack.c.bf16 %v1175_v59, %v1171_v29  ;;  %4495 = vst [vmem:[#allocation62_spill] sm:$0xff] %v4228_v52  ;;  %v1188_v46 = vld [vmem:[#allocation25 + $0x148] sm:$0xff] }
 0x5a3   :  { %2629 = vmatpush1.bf16.msra.mxu1 %v4170_v18  ;;  %v1192_v33 = vld [vmem:[#allocation25 + $0x168] sm:$0xff]  ;;  %4498 = vst [vmem:[#allocation65_spill] sm:$0xff] %v4237_v19 }
 0x5a4   :  { %2631 = vmatprep.subr.bf16.mxu1 %v4173_v61  ;;  %4494 = vst [vmem:[#allocation61_spill] sm:$0xff] %v4225_v12  ;;  %v1196_v29 = vld [vmem:[#allocation25 + $0x188] sm:$0xff] }
 0x5a5   :  { %v1200_v59 = vld [vmem:[#allocation25 + $0x1a8] sm:$0xff] }
 0x5a6   :  { %v4240_v30 = vpack.c.bf16 %v1200_v59, %v1196_v29  ;;  %v1203_v29 = vld [vmem:[#allocation25 + $0x1c0] sm:$0xff] }
 0x5a7   :  { %2633 = vmatpush1.bf16.msra.mxu1 %v4176_v10 }
 0x5a8   :  { %2635 = vmatprep.subr.bf16.mxu1 %v4179_v54  ;;  %4499 = vst [vmem:[#allocation66_spill] sm:$0xff] %v4240_v30 }
 0x5ab   :  { %2637 = vmatpush1.bf16.msra.mxu1 %v4182_v38 }
 0x5ac   :  { %2639 = vmatprep.subr.bf16.mxu1 %v4185_v51 }
 0x5af   :  { %2641 = vmatpush1.bf16.msra.mxu1 %v4188_v4 }
 0x5b0   :  { %2643 = vmatprep.subr.bf16.mxu1 %v4191_v1 }
 0x5b3   :  { %2645 = vmatpush1.bf16.msra.mxu1 %v4194_v27 }
 0x5b4   :  { %2647 = vmatprep.subr.bf16.mxu1 %v4197_v2 }
 0x5b7   :  { %2649 = vmatpush1.bf16.msra.mxu1 %v4200_v13 }
 0x5b8   :  { %2683 = vmatprep.subr.bf16.mxu1 %v4203_v8 }
 0x5ba   :  { %1342 = vmatmul.mubr.f32.vlgmr.msra.gmra.mrb[4].mxu1 %v3004_v31  ;;  %v4222_v31 = vpack.c.bf16 %v1176_v32, %v1172_v22  ;;  %v4231_v22 = vpack.c.bf16 %v1183_v60, %v1179_v3  ;;  %v4234_v32 = vpack.c.bf16 %v1192_v33, %v1188_v46  ;;  %v1195_v60 = vld [vmem:[#allocation25 + $0x180] sm:$0xff]  ;;  %v1197_v46 = vld [vmem:[#allocation25 + $0x190] sm:$0xff] }
 0x5bb   :  { %2685 = vmatpush1.bf16.msra.mxu1 %v4206_v15  ;;  %1483 = vmatprep.mubr.f32.mxu1 %v4491_v34  ;;  %v1199_v3 = vld [vmem:[#allocation25 + $0x1a0] sm:$0xff] }
 0x5bc   :  { %2687 = vmatprep.subr.bf16.mxu1 %v4209_v55  ;;  %4493 = vst [vmem:[#allocation60_spill] sm:$0xff] %v4222_v31  ;;  %4496 = vst [vmem:[#allocation63_spill] sm:$0xff] %v4231_v22  ;;  %v4244_v33 = vpack.c.bf16 %v1199_v3, %v1195_v60 }
 0x5bd   :  { %4497 = vst [vmem:[#allocation64_spill] sm:$0xff] %v4234_v32 }
 0x5bf   :  { %2689 = vmatpush1.bf16.msra.mxu1 %v4212_v45 }
 0x5c0   :  { %2691 = vmatprep.subr.bf16.mxu1 %v4216_v37 }
 0x5c3   :  { %2693 = vmatpush1.bf16.msra.mxu1 %v4219_v21 }
 0x5c4   :  { %2695 = vmatprep.subr.bf16.mxu1 %v4222_v31  ;;  %v1208_v31 = vld [vmem:[#allocation25 + $0x1e8] sm:$0xff] }
 0x5c7   :  { %2697 = vmatpush1.bf16.msra.mxu1 %v4225_v12  ;;  %v1204_v12 = vld [vmem:[#allocation25 + $0x1c8] sm:$0xff] }
 0x5c8   :  { %2699 = vmatprep.subr.bf16.mxu1 %v4228_v52  ;;  %v1201_v52 = vld [vmem:[#allocation25 + $0x1b0] sm:$0xff]  ;;  %v4248_v16 = vpack.c.bf16 %v1208_v31, %v1204_v12  ;;  %v2215_v12 = vld [vmem:[#allocation22] ss:$0 sm:$0xff] }
 0x5c9   :  { %v4246_v21 = vpack.c.bf16 %v1201_v52, %v1197_v46 }
 0x5cb   :  { %2701 = vmatpush1.bf16.msra.mxu1 %v4231_v22  ;;  %v1209_v22 = vld [vmem:[#allocation25 + $0x1f0] sm:$0xff]  ;;  %2741 = vmatpush1.bf16.msra.mxu0 %v4246_v21 }
 0x5cc   :  { %2703 = vmatprep.subr.bf16.mxu1 %v4234_v32  ;;  %v1210_v32 = vld [vmem:[#allocation25 + $0x1f8] sm:$0xff] }
 0x5cd   :  { %v4251_v59 = vpack.c.bf16 %v1210_v32, %v1206_v48  ;;  %v4515_v48 = vld [vmem:[#allocation58_spill] sm:$0xff] }
 0x5cf   :  { %2705 = vmatpush1.bf16.msra.mxu1 %v4237_v19  ;;  %v1205_v19 = vld [vmem:[#allocation25 + $0x1d0] sm:$0xff]  ;;  %2743 = vmatprep.subr.bf16.mxu0 %v4251_v59 }
 0x5d0   :  { %2707 = vmatprep.subr.bf16.mxu1 %v4240_v30  ;;  %v1207_v30 = vld [vmem:[#allocation25 + $0x1e0] sm:$0xff]  ;;  %v4257_v52 = vpack.c.bf16 %v1209_v22, %v1205_v19  ;;  %v4513_v22 = vld [vmem:[#allocation57_spill] sm:$0xff] }
 0x5d1   :  { %v4255_v60 = vpack.c.bf16 %v1207_v30, %v1203_v29  ;;  %v4514_v19 = vld [vmem:[#allocation66_spill] sm:$0xff] }
 0x5d2   :  { %2745 = vmatpush1.bf16.msra.mxu0 %v4257_v52 }
 0x5d3   :  { %2709 = vmatpush1.bf16.msra.mxu1 %v4244_v33  ;;  %2779 = vmatprep.subr.bf16.mxu0 %v4041_v11 }
 0x5d4   :  { %2711 = vmatprep.subr.bf16.mxu1 %v4248_v16 }
 0x5d7   :  { %2713 = vmatpush1.bf16.msra.mxu1 %v4255_v60 }
 0x5d8   :  { %2747 = vmatprep.subr.bf16.mxu1 %v4039_v7 }
 0x66d   :  { %v1065_v31 = vpop.f32.mrb[2].mxu1 }
 0x66e   :  { %v1136_v32 = vadd.f32 %v3991_v49, %v1065_v31  ;;  %v2462_v3 = vpop.f32.mrb[3].mxu1  ;;  %v1275_v49 = vld [vmem:[#allocation28] sm:$0xf]  ;;  %v4516_v31 = vmov 0  }
 0x66f   :  { %v4300_v7 = vrot.slane %v1275_v49, %v3939_v56  ;;  %v4303_v11 = vrot.slane %v1275_v49, %v3996_v53  ;;  %v2919_v3 = vld [vmem:[#allocation29 + $0x10] ss:$8 sps:$4 sm:$0xff]  }
 0x670   :  { %v1146_v46 = vadd.f32 %v2215_v12, %v1136_v32  ;;  %v2918_v12 = vld [vmem:[#allocation29 + $0x4] ss:$8 sps:$4 sm:$0xff]   ;;  %v2916_v32 = vld [vmem:[#allocation29] ss:$8 sps:$4 sm:$0xff]  }
 0x672   :  { %v1276_v30 = vmax.f32 %v1146_v46, 0.0  ;;  %v2928_v46 = vld [vmem:[#allocation29 + $0x40] ss:$8 sps:$4 sm:$0xff]  }
 0x674   :  { %1484 = vmatmul.mubr.f32.vlgmr.msra.gmra.mrb[4].mxu1 %v1276_v30  ;;  %1555 = vmatmul.mubr.f32.vlgmr.msra.gmra.mrb[6].mxu0 %v1276_v30  ;;  %v2931_v30 = vld [vmem:[#allocation29 + $0x50] ss:$8 sps:$4 sm:$0xff]  }
 0x675   :  { %2749 = vmatpush1.bf16.msra.mxu1 %v4156_v25  ;;  %2781 = vmatpush1.bf16.msra.mxu0 %v4043_v17 }
 0x676   :  { %2751 = vmatprep.subr.bf16.mxu1 %v4159_v41  ;;  %2783 = vmatprep.subr.bf16.mxu0 %v4046_v23 }
 0x677   :  { %1675 = vmatprep.mubr.f32.mxu1 %v4491_v34  ;;  %1746 = vmatprep.mubr.f32.mxu0 %v4491_v34 }
 0x679   :  { %2753 = vmatpush1.bf16.msra.mxu1 %v4163_v62  ;;  %2785 = vmatpush1.bf16.msra.mxu0 %v4051_v26  ;;  %v285_v62 = vld [vmem:[#allocation11] sm:$0xf] }
 0x67a   :  { %2755 = vmatprep.subr.bf16.mxu1 %v4167_v6  ;;  %2787 = vmatprep.subr.bf16.mxu0 %v4053_v36 }
 0x67d   :  { %2757 = vmatpush1.bf16.msra.mxu1 %v4170_v18  ;;  %2789 = vmatpush1.bf16.msra.mxu0 %v4057_v39 }
 0x67e   :  { %2759 = vmatprep.subr.bf16.mxu1 %v4173_v61  ;;  %2791 = vmatprep.subr.bf16.mxu0 %v4059_v40 }
 0x681   :  { %2761 = vmatpush1.bf16.msra.mxu1 %v4176_v10  ;;  %2793 = vmatpush1.bf16.msra.mxu0 %v4063_v28 }
 0x682   :  { %2763 = vmatprep.subr.bf16.mxu1 %v4179_v54  ;;  %2795 = vmatprep.subr.bf16.mxu0 %v4065_v42 }
 0x685   :  { %2765 = vmatpush1.bf16.msra.mxu1 %v4182_v38  ;;  %2797 = vmatpush1.bf16.msra.mxu0 %v4069_v44  ;;  %v4308_v44 = vrot.slane %v1275_v49, %v4005_v9 }
 0x686   :  { %2767 = vmatprep.subr.bf16.mxu1 %v4185_v51  ;;  %2799 = vmatprep.subr.bf16.mxu0 %v4071_v47 }
 0x689   :  { %2769 = vmatpush1.bf16.msra.mxu1 %v4188_v4  ;;  %2801 = vmatpush1.bf16.msra.mxu0 %v4075_v50  ;;  %v4312_v50 = vrot.slane %v1275_v49, %v4001_v58  ;;  %v2933_v49 = vld [vmem:[#allocation29 + $0x54] ss:$8 sps:$4 sm:$0xff]  }
 0x68a   :  { %2771 = vmatprep.subr.bf16.mxu1 %v4191_v1  ;;  %2803 = vmatprep.subr.bf16.mxu0 %v4077_v57  ;;  %v4500_v1 = vld [vmem:[#allocation59_spill] sm:$0xff] }
 0x68d   :  { %2773 = vmatpush1.bf16.msra.mxu1 %v4194_v27  ;;  %2805 = vmatpush1.bf16.msra.mxu0 %v4081_v63  ;;  %v4501_v27 = vld [vmem:[#allocation51_spill] sm:$0xff] }
 0x68e   :  { %2775 = vmatprep.subr.bf16.mxu1 %v4197_v2  ;;  %2807 = vmatprep.subr.bf16.mxu0 %v4083_v5  ;;  %v4503_v2 = vld [vmem:[#allocation52_spill] sm:$0xff] }
 0x691   :  { %2777 = vmatpush1.bf16.msra.mxu1 %v4200_v13  ;;  %2809 = vmatpush1.bf16.msra.mxu0 %v4087_v14  ;;  %v4505_v13 = vld [vmem:[#allocation53_spill] sm:$0xff] }
 0x692   :  { %2811 = vmatprep.subr.bf16.mxu1 %v4203_v8  ;;  %2843 = vmatprep.subr.bf16.mxu0 %v4089_v0  ;;  %v4506_v8 = vld [vmem:[#allocation62_spill] sm:$0xff] }
 0x747   :  { %v1485_v17 = vpop.f32.mrb[4].mxu1  ;;  %v1556_v23 = vpop.f32.mrb[6].mxu0 }
 0x748   :  { %v1582_v26 = vadd.f32 %v4300_v7, %v1485_v17  ;;  %v1487_v36 = vpop.f32.mrb[5].mxu1  ;;  %v1558_v39 = vpop.f32.mrb[7].mxu0  ;;  %v1584_v63 = vadd.f32 %v4312_v50, %v1556_v23  ;;  %v2936_v17 = vld [vmem:[#allocation29 + $0x64] ss:$8 sps:$4 sm:$0xff]   ;;  %v2934_v23 = vld [vmem:[#allocation29 + $0x60] ss:$8 sps:$4 sm:$0xff]  }
 0x749   :  { %v1583_v40 = vadd.f32 %v4303_v11, %v1487_v36  ;;  %v1585_v47 = vadd.f32 %v4308_v44, %v1558_v39  ;;  %v2937_v36 = vld [vmem:[#allocation29 + $0x70] ss:$8 sps:$4 sm:$0xff]  }
 0x74a   :  { %v2216_v28 = vmul.f32 -1.442695, %v1582_v26  ;;  %v2939_v26 = vld [vmem:[#allocation29 + $0x74] ss:$8 sps:$4 sm:$0xff]  }
 0x74b   :  { %v2217_v42 = vmul.f32 -1.442695, %v1583_v40  ;;  %v2218_v57 = vmul.f32 -1.442695, %v1585_v47 }
 0x74c   :  { %2964 = vpow2.f32 %v2216_v28 }
 0x74d   :  { %2966 = vpow2.f32 %v2217_v42 }
 0x74e   :  { %2968 = vpow2.f32 %v2218_v57 }
 0x74f   :  { %2970 = vtanh.f32 %v1584_v63 }
 0x756   :  { %v2965_v5 = vpop.eup %2964 }
 0x757   :  { %v2967_v14 = vpop.eup %2966  ;;  %v1589_v0 = vadd.f32 1.0, %v2965_v5 }
 0x758   :  { %v1595_v25 = vadd.f32 1.0, %v2967_v14  ;;  %v2969_v9 = vpop.eup %2968 }
 0x759   :  { %2972 = vrcp.f32 %v1589_v0  ;;  %v2971_v41 = vpop.eup %2970  ;;  %v1602_v10 = vadd.f32 1.0, %v2969_v9 }
 0x75a   :  { %2974 = vrcp.f32 %v1595_v25 }
 0x75b   :  { %2976 = vrcp.f32 %v1602_v10 }
 0x763   :  { %v2973_v6 = vpop.eup %2972 }
 0x764   :  { %v2975_v18 = vpop.eup %2974  ;;  %v1606_v61 = vmul.f32 %v2973_v6, %v2971_v41 }
 0x765   :  { %v1605_v58 = vmul.f32 %v2975_v18, %v285_v62  ;;  %v2977_v38 = vpop.eup %2976 }
 0x767   :  { %v4315_v54 = vadd.f32 %v1606_v61, %v1605_v58 }
 0x769   :  { %2978 = vtanh.f32 %v4315_v54 }
 0x773   :  { %v2979_v51 = vpop.eup %2978 }
 0x774   :  { %v1609_v4 = vmul.f32 %v2979_v51, %v2977_v38 }
 0x776   :  { %1676 = vmatmul.mubr.f32.vlgmr.msra.gmra.mrb[6].mxu1 %v1609_v4  ;;  %1747 = vmatmul.mubr.f32.vlgmr.msra.gmra.mrb[8].mxu0 %v1609_v4  ;;  %v1610_v29 = vmax.f32 %v1609_v4, 0.0 }
 0x777   :  { %2813 = vmatpush1.bf16.msra.mxu1 %v4206_v15  ;;  %2845 = vmatpush1.bf16.msra.mxu0 %v4093_v35  ;;  %v4502_v35 = vld [vmem:[#allocation60_spill] sm:$0xff]  ;;  %v4507_v15 = vld [vmem:[#allocation54_spill] sm:$0xff] }
 0x778   :  { %2815 = vmatprep.subr.bf16.mxu1 %v4209_v55  ;;  %2847 = vmatprep.subr.bf16.mxu0 %v4095_v20  ;;  %v4504_v20 = vld [vmem:[#allocation61_spill] sm:$0xff]  ;;  %v4509_v55 = vld [vmem:[#allocation55_spill] sm:$0xff] }
 0x779   :  { %1817 = vmatprep.mubr.f32.mxu1 %v4491_v34  ;;  %1888 = vmatprep.mubr.f32.mxu0 %v4491_v34 }
 0x77b   :  { %2817 = vmatpush1.bf16.msra.mxu1 %v4212_v45  ;;  %2849 = vmatpush1.bf16.msra.mxu0 %v4101_v24  ;;  %v4508_v24 = vld [vmem:[#allocation63_spill] sm:$0xff]  ;;  %v4511_v45 = vld [vmem:[#allocation56_spill] sm:$0xff] }
 0x77c   :  { %2819 = vmatprep.subr.bf16.mxu1 %v4216_v37  ;;  %2851 = vmatprep.subr.bf16.mxu0 %v4103_v43  ;;  %v4510_v43 = vld [vmem:[#allocation64_spill] sm:$0xff]  ;;  %v4512_v37 = vld [vmem:[#allocation65_spill] sm:$0xff] }
 0x77f   :  { %2821 = vmatpush1.bf16.msra.mxu1 %v4500_v1  ;;  %2853 = vmatpush1.bf16.msra.mxu0 %v4501_v27 }
 0x780   :  { %2823 = vmatprep.subr.bf16.mxu1 %v4502_v35  ;;  %2855 = vmatprep.subr.bf16.mxu0 %v4503_v2  ;;  %v3517_v35 = vmov -1e+30  }
 0x781   :  { %1928 = vst.msk [vmem:[#allocation3] sm:$0xf] %vm1927_vm6, %v3517_v35 }
 0x783   :  { %2825 = vmatpush1.bf16.msra.mxu1 %v4504_v20  ;;  %2857 = vmatpush1.bf16.msra.mxu0 %v4505_v13 }
 0x784   :  { %2827 = vmatprep.subr.bf16.mxu1 %v4506_v8  ;;  %2859 = vmatprep.subr.bf16.mxu0 %v4507_v15 }
 0x787   :  { %2829 = vmatpush1.bf16.msra.mxu1 %v4508_v24  ;;  %2861 = vmatpush1.bf16.msra.mxu0 %v4509_v55 }
 0x788   :  { %2831 = vmatprep.subr.bf16.mxu1 %v4510_v43  ;;  %2863 = vmatprep.subr.bf16.mxu0 %v4511_v45 }
 0x78b   :  { %2833 = vmatpush1.bf16.msra.mxu1 %v4512_v37  ;;  %2865 = vmatpush1.bf16.msra.mxu0 %v4513_v22 }
 0x78c   :  { %2835 = vmatprep.subr.bf16.mxu1 %v4514_v19  ;;  %2867 = vmatprep.subr.bf16.mxu0 %v4515_v48 }
 0x78f   :  { %2837 = vmatpush1.bf16.msra.mxu1 %v4244_v33  ;;  %2869 = vmatpush1.bf16.msra.mxu0 %v4246_v21  ;;  %v2921_v33 = vld [vmem:[#allocation29 + $0x14] ss:$8 sps:$4 sm:$0xff]   ;;  %v2924_v21 = vld [vmem:[#allocation29 + $0x24] ss:$8 sps:$4 sm:$0xff]  }
 0x790   :  { %2839 = vmatprep.subr.bf16.mxu1 %v4248_v16  ;;  %2871 = vmatprep.subr.bf16.mxu0 %v4251_v59  ;;  %v2922_v16 = vld [vmem:[#allocation29 + $0x20] ss:$8 sps:$4 sm:$0xff]   ;;  %v2927_v59 = vld [vmem:[#allocation29 + $0x34] ss:$8 sps:$4 sm:$0xff]  }
 0x793   :  { %2841 = vmatpush1.bf16.msra.mxu1 %v4255_v60  ;;  %2873 = vmatpush1.bf16.msra.mxu0 %v4257_v52  ;;  %v2925_v60 = vld [vmem:[#allocation29 + $0x30] ss:$8 sps:$4 sm:$0xff]   ;;  %v2930_v52 = vld [vmem:[#allocation29 + $0x44] ss:$8 sps:$4 sm:$0xff]  }
 0x794   :  { %2043 = vmatprep.subr.bf16.mxu1 %v2918_v12 }
 0x796   :  { %1818 = vmatmul.mubr.f32.vlgmr.msra.gmra.mrb[6].mxu1 %v1610_v29  ;;  %1889 = vmatmul.mubr.f32.vlgmr.msra.gmra.mrb[8].mxu0 %v1610_v29 }
 0x797   :  { %2075 = vmatprep.mubr.bf16.mxu1 %v4516_v31  ;;  %2044 = vmatpush1.bf16.msra.mxu1 %v2916_v32 }
 0x798   :  { %2045 = vmatprep.subr.bf16.mxu1 %v2921_v33 }
 0x79b   :  { %2046 = vmatpush1.bf16.msra.mxu1 %v2919_v3 }
 0x79c   :  { %2047 = vmatprep.subr.bf16.mxu1 %v2924_v21 }
 0x79f   :  { %2048 = vmatpush1.bf16.msra.mxu1 %v2922_v16 }
 0x7a0   :  { %2049 = vmatprep.subr.bf16.mxu1 %v2927_v59 }
 0x7a3   :  { %2050 = vmatpush1.bf16.msra.mxu1 %v2925_v60 }
 0x7a4   :  { %2051 = vmatprep.subr.bf16.mxu1 %v2930_v52 }
 0x7a7   :  { %2052 = vmatpush1.bf16.msra.mxu1 %v2928_v46  ;;  %v2099_v46 = vld [vmem:[#allocation4] sm:$0xf] }
 0x7a8   :  { %2053 = vmatprep.subr.bf16.mxu1 %v2933_v49 }
 0x7ab   :  { %2054 = vmatpush1.bf16.msra.mxu1 %v2931_v30 }
 0x7ac   :  { %2055 = vmatprep.subr.bf16.mxu1 %v2936_v17 }
 0x7af   :  { %2056 = vmatpush1.bf16.msra.mxu1 %v2934_v23 }
 0x7b0   :  { %2057 = vmatprep.subr.bf16.mxu1 %v2939_v26 }
 0x7b3   :  { %2058 = vmatpush1.bf16.msra.mxu1 %v2937_v36 }
 0x869   :  { %v1819_v39 = vpop.f32.mrb[6].mxu1  ;;  %v1890_v40 = vpop.f32.mrb[8].mxu0 }
 0x86a   :  { %v1895_v28 = vadd.f32 %v1819_v39, %v4300_v7  ;;  %v1821_v42 = vpop.f32.mrb[7].mxu1  ;;  %v1892_v47 = vpop.f32.mrb[9].mxu0  ;;  %v1897_v25 = vadd.f32 %v1890_v40, %v4312_v50 }
 0x86b   :  { %v1896_v57 = vadd.f32 %v1821_v42, %v4303_v11  ;;  %v1898_v14 = vadd.f32 %v1892_v47, %v4308_v44 }
 0x86c   :  { %v2219_v63 = vmul.f32 -1.442695, %v1895_v28 }
 0x86d   :  { %v2220_v5 = vmul.f32 -1.442695, %v1896_v57  ;;  %v2221_v0 = vmul.f32 -1.442695, %v1898_v14 }
 0x86e   :  { %2980 = vpow2.f32 %v2219_v63 }
 0x86f   :  { %2982 = vpow2.f32 %v2220_v5 }
 0x870   :  { %2984 = vpow2.f32 %v2221_v0 }
 0x871   :  { %2986 = vtanh.f32 %v1897_v25 }
 0x878   :  { %v2981_v9 = vpop.eup %2980 }
 0x879   :  { %v2983_v41 = vpop.eup %2982  ;;  %v1902_v62 = vadd.f32 1.0, %v2981_v9 }
 0x87a   :  { %v1908_v6 = vadd.f32 1.0, %v2983_v41  ;;  %v2985_v7 = vpop.eup %2984 }
 0x87b   :  { %2988 = vrcp.f32 %v1902_v62  ;;  %v2987_v18 = vpop.eup %2986  ;;  %v1915_v58 = vadd.f32 1.0, %v2985_v7 }
 0x87c   :  { %2990 = vrcp.f32 %v1908_v6 }
 0x87d   :  { %2992 = vrcp.f32 %v1915_v58 }
 0x885   :  { %v2989_v11 = vpop.eup %2988 }
 0x886   :  { %v2991_v61 = vpop.eup %2990  ;;  %v1919_v10 = vmul.f32 %v2989_v11, %v2987_v18 }
 0x887   :  { %v1918_v38 = vmul.f32 %v2991_v61, %v4315_v54  ;;  %v2993_v50 = vpop.eup %2992  ;;  %v1951_v54 = vld [vmem:[#allocation31] sm:$0x3] }
 0x888   :  { %v1956_v2 = vrot.slane %v1951_v54, %v3939_v56  ;;  %v1960_v20 = vrot.slane %v1951_v54, %v3996_v53  ;;  %v2091_v56 = vld [vmem:[#allocation3] sm:$0xf] }
 0x889   :  { %v1920_v44 = vadd.f32 %v1919_v10, %v1918_v38 }
 0x88b   :  { %2994 = vtanh.f32 %v1920_v44  ;;  %1924 = vst [vmem:[#allocation35] sm:$0xf] %v1920_v44 }
 0x895   :  { %v2995_v51 = vpop.eup %2994 }
 0x896   :  { %v1922_v4 = vmul.f32 %v2995_v51, %v2993_v50 }
 0x898   :  { %v1925_v1 = vpack.c.bf16 %v1922_v4, %v1922_v4  ;;  %1923 = vst [vmem:[#allocation33] sm:$0xf] %v1922_v4 }
 0x89a   :  { %1926 = vst [vmem:[#allocation2] sm:$0x3] %v1925_v1 }
 0x8a1   :  { %v1931_v27 = vld [vmem:[#allocation2] sm:$0x3] }
 0x8a2   :  { %2076 = vmatmul.mubr.bf16.vlgmr.msra.gmra.mrb[8].mxu1 %v1931_v27 }
 0x975   :  { %v2077_v13 = vpop.f32.mrb[8].mxu1 }
 0x976   :  { %v4361_v8 = vadd.f32 %v2077_v13, %v1956_v2  ;;  %v2079_v15 = vpop.f32.mrb[9].mxu1 }
 0x977   :  { %v4363_v24 = vadd.f32 %v2079_v15, %v1960_v20  ;;  %v2081_v55 = vpop.f32.mrb[10].mxu1 }
 0x978   :  { %v2082_v43 = vpop.f32.mrb[11].mxu1  ;;  %v2093_v45 = vsel %vm2092_vm7, %v4361_v8, -inf }
 0x979   :  { %v2094_v34 = vsel %vm2092_vm7, %v4363_v24, -inf }
 0x97a   :  { %v2095_v37 = vmax.f32 %v2093_v45, %v2094_v34 }
 0x97c   :  { %2096 = vmax.xlane.f32.xlu1 %v2095_v37 }
 0xa09   :  { %v2097_v22 = vpop.xlane.xlu1 %2096 }
 0xa0a   :  { %v2098_v53 = vmax.f32 %v2091_v56, %v2097_v22 }
 0xa0c   :  { %v2100_v19 = vsub.f32 %v2091_v56, %v2098_v53  ;;  %2123 = vst.msk [vmem:[#allocation3] sm:$0xf] %vm1927_vm6, %v2098_v53  ;;  %2106 = vperm.xlu0 %2915, %v2098_v53  }
 0xa0e   :  { %v2101_v60 = vmul.f32 1.442695, %v2100_v19 }
 0xa13   :  { %v2127_v39 = vld [vmem:[#allocation3] sm:$0xf] }
 0xa8b   :  { %v2107_v48 = vpop.permute.xlu0 %2106 }
 0xa8c   :  { %v2109_v29 = vsub.f32 %v4361_v8, %v2107_v48  ;;  %v2110_v31 = vsub.f32 %v4363_v24, %v2107_v48 }
 0xa8e   :  { %v2111_v12 = vmul.f32 1.442695, %v2109_v29  ;;  %v2113_v32 = vmul.f32 1.442695, %v2110_v31 }
 0xa90   :  { %2996 = vpow2.f32 %v2111_v12 }
 0xa91   :  { %2998 = vpow2.f32 %v2113_v32 }
 0xa92   :  { %3000 = vpow2.f32 %v2101_v60 }
 0xa9a   :  { %v2997_v33 = vpop.eup %2996 }
 0xa9b   :  { %v2999_v3 = vpop.eup %2998  ;;  %v2115_v21 = vsel %vm2092_vm7, %v2997_v33, 0.0 }
 0xa9c   :  { %v2116_v16 = vsel %vm2092_vm7, %v2999_v3, 0.0  ;;  %v3001_v52 = vpop.eup %3000 }
 0xa9d   :  { %v2117_v59 = vadd.f32 %v2116_v16, %v2115_v21  ;;  %v2103_v30 = vmul.f32 %v3001_v52, %v2099_v46 }
 0xa9f   :  { %2118 = vadd.xlane.f32.xlu1 %v2117_v59 }
 0xb2c   :  { %v2119_v49 = vpop.xlane.xlu1 %2118 }
 0xb2d   :  { %v2120_v17 = vadd.f32 %v2119_v49, %v2103_v30 }
 0xb2f   :  { %2122 = vst.msk [vmem:[#allocation4] sm:$0xf] %vm1927_vm6, %v2120_v17 }
 0xb36   :  { %v2128_v23 = vld [vmem:[#allocation4] sm:$0xf] }
 0xb37   :  { %3002 = vlog2.f32 %v2128_v23 }
 0xb41   :  { %v3003_v26 = vpop.eup %3002 }
 0xb42   :  { %v2130_v36 = vmul.f32 0.6931472, %v3003_v26 }
 0xb44   :  { %v2131_v40 = vadd.f32 %v2130_v36, %v2127_v39 }
 0xb46   :  { %2135 = vperm.xlu0 %2915, %v2131_v40  }
 0xb47   :  { %3390 = shalt.err (!%p3387_p0)
}
 0xb48   :  { %s3391_s5 = scalar_lea.hbm %s4444_s18, 64 }
 0xb49   :  { %p3392_p1 = scmp.ne.s32.totalorder %s4444_s18, %s3391_s5  ;;  %p3395_p2 = scmp.lt.u32.totalorder %s3391_s5, %s4444_s18 }
 0xb4b   :  { %p3397_p3 = pnand %p3395_p2, %p3392_p1 }
 0xb4d   :  { %3400 = shalt.err (!%p3397_p3)
}
 0xb4e   :  { %2166 = dma.vmem_to_hbm [thread:$0]  %s2164_s9, 64, %s4444_s18, [#allocation34]  }
 0xb4f   :  { %s3519_s2 = smov [#allocation35]   ;;  %s3520_s23 = smov [#allocation36]  }
 0xb50   :  { %s2173_s12 = sshll.u32 %s3519_s2, 4  ;;  %s2183_s26 = sshll.u32 %s3520_s23, 4  ;;  %s2174_s12 = int_to_ptr.vmem [resolvable:$true] %s2173_s12  ;;  %s2184_s26 = int_to_ptr.vmem [resolvable:$true] %s2183_s26 }
 0xb51   :  { %s3401_s22 = scalar_lea.vmem %s2174_s12, 64  ;;  %p3406_p5 = scmp.lt.s32.totalorder %s2174_s12, %s2174_s12 }
 0xb52   :  { %p3402_p4 = scmp.ne.s32.totalorder %s2174_s12, %s3401_s22  ;;  %p3407_p6 = scmp.lt.s32.totalorder %s3401_s22, %s3401_s22 }
 0xb54   :  { %p3408_p7 = por %p3407_p6, %p3406_p5 }
 0xb56   :  { %p3409_p8 = pnand %p3408_p7, %p3402_p4 }
 0xb58   :  { %3412 = shalt.err (!%p3409_p8)
}
 0xb59   :  { %s3413_s15 = scalar_lea.hbm %s4445_s19, 64 }
 0xb5a   :  { %p3414_p9 = scmp.ne.s32.totalorder %s4445_s19, %s3413_s15  ;;  %p3417_p10 = scmp.lt.u32.totalorder %s3413_s15, %s4445_s19 }
 0xb5c   :  { %p3419_p11 = pnand %p3417_p10, %p3414_p9 }
 0xb5e   :  { %3422 = shalt.err (!%p3419_p11)
}
 0xb5f   :  { %2176 = dma.vmem_to_hbm [thread:$0]  %s2174_s12, 64, %s4445_s19, [#allocation34]  }
 0xb60   :  { %s3423_s14 = scalar_lea.vmem %s2184_s26, 64  ;;  %p3428_p13 = scmp.lt.s32.totalorder %s2184_s26, %s2184_s26 }
 0xb61   :  { %p3424_p12 = scmp.ne.s32.totalorder %s2184_s26, %s3423_s14  ;;  %p3429_p0 = scmp.lt.s32.totalorder %s3423_s14, %s3423_s14 }
 0xb63   :  { %p3430_p1 = por %p3429_p0, %p3428_p13 }
 0xb65   :  { %p3431_p2 = pnand %p3430_p1, %p3424_p12 }
 0xb67   :  { %3434 = shalt.err (!%p3431_p2)
}
 0xb68   :  { %s3435_s9 = scalar_lea.hbm %s4446_s20, 64 }
 0xb69   :  { %p3436_p3 = scmp.ne.s32.totalorder %s4446_s20, %s3435_s9  ;;  %p3439_p4 = scmp.lt.u32.totalorder %s3435_s9, %s4446_s20 }
 0xb6b   :  { %p3441_p5 = pnand %p3439_p4, %p3436_p3 }
 0xb6d   :  { %3444 = shalt.err (!%p3441_p5)
}
 0xb6e   :  { %2186 = dma.vmem_to_hbm [thread:$0]  %s2184_s26, 64, %s4446_s20, [#allocation37]   ;;  %v3521_v28 = vmov 839922192   ;;  %v4517_v57 = vld [vmem:[#allocation50_spill] sm:$0xff]  ;;  %v2086_v14 = vcombine.low %v4361_v8, %v4363_v24 }
 0xb6f   :  { %v2138_v42 = vunpack.c.l.s4 %v3521_v28  ;;  %s3522_s0 = smov [#allocation32]  }
 0xb70   :  { %s2153_s27 = sshll.u32 %s3522_s0, 4  ;;  %s2154_s27 = int_to_ptr.vmem [resolvable:$true] %s2153_s27 }
 0xb71   :  { %v2139_v47 = vunpack.c.0.s8 %v2138_v42  ;;  %s3445_s24 = scalar_lea.vmem %s2154_s27, 128  ;;  %p3450_p7 = scmp.lt.s32.totalorder %s2154_s27, %s2154_s27 }
 0xb72   :  { %p3446_p6 = scmp.ne.s32.totalorder %s2154_s27, %s3445_s24  ;;  %p3451_p8 = scmp.lt.s32.totalorder %s3445_s24, %s3445_s24 }
 0xb73   :  { %v2142_v63 = vsub.s32 %v2139_v47, %v4517_v57 }
 0xb74   :  { %p3452_p9 = por %p3451_p8, %p3450_p7 }
 0xb76   :  { %p3453_p10 = pnand %p3452_p9, %p3446_p6 }
 0xbc5   :  { %v2136_v5 = vpop.permute.xlu0 %2135 }
 0xbc6   :  { %v2143_v0 = vrot.slane %v2136_v5, %v2142_v63 }
 0xbc8   :  { %v2145_v25 = vsub.f32 %v2086_v14, %v2143_v0 }
 0xbca   :  { %2146 = vst [vmem:[#allocation32] sm:$0xff] %v2145_v25 }
 0xbcb   :  { %3456 = shalt.err (!%p3453_p10)
}
 0xbcc   :  { %s3457_s8 = scalar_lea.hbm %s4443_s17, 128 }
 0xbcd   :  { %p3458_p11 = scmp.ne.s32.totalorder %s4443_s17, %s3457_s8  ;;  %p3461_p12 = scmp.lt.u32.totalorder %s3457_s8, %s4443_s17 }
 0xbcf   :  { %p3463_p13 = pnand %p3461_p12, %p3458_p11 }
 0xbd1   :  { %3466 = shalt.err (!%p3463_p13)
}
 0xbd2   :  { %2156 = dma.vmem_to_hbm [thread:$0]  %s2154_s27, 128, %s4443_s17, [#allocation7]  }
 0xbd3   :  { %3485 = dma.done.wait [#allocation7], 128  }
 0xbd4   :  { %3486 = vsyncadd [#allocation7], 4294967168 }
 0xbd5   :  { %3487 = dma.done.wait [#allocation34], 128  }
 0xbd6   :  { %3488 = vsyncadd [#allocation34], 4294967168 }
 0xbd7   :  { %3489 = dma.done.wait [#allocation37], 64  }
 0xbd8   :  { %3490 = vsyncadd [#allocation37], 4294967232 }
 0xbd9   :  { %2199 = vsyncpa [#allocation6], 1 }
 0xbda   :  { %2200 = vsyncpa [#allocation9], 1 }
 0xbdb   :  { %2201 = vsyncpa [#allocation12], 1 }
 0xbdc   :  { %2202 = vsyncpa [#allocation15], 1 }
 0xbdd   :  { %2203 = vsyncpa [#allocation18], 1 }
 0xbde   :  { %2204 = vsyncpa [#allocation21], 1 }
 0xbdf   :  { %2205 = vsyncpa [#allocation24], 1 }
 0xbe0   :  { %2206 = vsyncpa [#allocation27], 1 }
 0xbe1   :  { %2207 = vsyncpa [#allocation30], 1 }
 0xbe2   :  { %2208 = vsyncpa [#allocation7], 1 }
 0xbe3   :  { %2209 = vsyncpa [#allocation34], 1 }
 0xbe4   :  { %2210 = vsyncpa [#allocation37], 1 }

</bundles_post_ra>
